<compile_context>
chip_gen: v7x
topology: tpu7x:2x2x1
jax: 0.10.0
libtpu: 0.0.40
codegen_flags: <defaults>
</compile_context>

<pallas_src>
import functools
import math

import jax
import jax.numpy as jnp
from jax import lax
from jax.experimental import pallas as pl
from jax.experimental.pallas import tpu as pltpu

# ---- small config (shape-consistent with MistralConfig semantics) ----
VOCAB = 256                     # src_vocab_size
NHEADS = 4                      # nheads
KVHEADS = 2                     # kvheads (GQA)
HEAD_DIM = 16                   # head_dim
EMB = NHEADS * HEAD_DIM         # emb_dim = 64 (true width)
EMB_PAD = 128                   # zero-padded residual width (lane-dense)
NLAYERS = 2                     # nlayers
HIDDEN_GROW = 14336 / 4096      # hidden_grow_factor = 3.5
MULTIPLE_OF = 32
HIDDEN = MULTIPLE_OF * ((int(HIDDEN_GROW * EMB) + MULTIPLE_OF - 1) // MULTIPLE_OF)  # 224
HIDDEN_PAD = 256                # zero-padded hidden (exactly equivalent math)
NORM_EPS = 1e-5
SLIDING_WINDOW = 4000           # >> seq len, so effectively causal-only here
ROPE_BASE = 1000000.0
PAD_ID = -1                     # nn.Embedding padding_idx=-1 wraps to VOCAB-1

Q_DIM = NHEADS * HEAD_DIM       # 64
KV_DIM = KVHEADS * HEAD_DIM     # 32
QKV_DIM = Q_DIM + 2 * KV_DIM    # 128 (fused_weights=True)


# ---------------- in-kernel helpers ----------------

def _rms(x, w, eps, true_width):
    # LayerNormParameterized(use_mean=False, elementwise_scale=True,
    #                        elementwise_shift=False, use_high_precision_pow=True)
    # NOTE: divide by the TRUE embedding width (padded columns of x are zero).
    var = jnp.sum(x * x, axis=-1, keepdims=True) * (1.0 / true_width)
    return x * lax.rsqrt(var + eps) * w


# ---------------- the one fused whole-model kernel ----------------

def _model_kernel(x0_ref, cos_ref, sina_ref, sinb_ref,
                  ln_ref, wqkv_ref, wo_ref, ffln_ref, w1_ref, w2_ref,
                  dn_ref, head_ref, o_ref, x_sc, *,
                  batch, seq, nheads, kvheads, head_dim, hidden_pad,
                  emb_true, eps, window):
    f32 = jnp.float32
    bf16 = jnp.bfloat16
    group = nheads // kvheads
    d = head_dim
    q_dim = nheads * d
    kv_dim = kvheads * d
    qkv_w = q_dim + 2 * kv_dim
    n = batch * seq
    layer = pl.program_id(0)

    # Residual stream lives in VMEM scratch across the layer grid axis.
    @pl.when(layer == 0)
    def _():
        x_sc[...] = x0_ref[...]

    x = x_sc[...]                                                   # (N, EMB_PAD) f32

    # --- attention sub-layer ---
    xn = _rms(x, ln_ref[...], eps, emb_true)
    qkv = jnp.dot(xn.astype(bf16), wqkv_ref[...],
                  preferred_element_type=f32)                       # (N, 128)

    # RoPE on the full 128-wide qkv tile: each column's rotation partner is +/- d/2 lanes
    # away (per-head [evens|odds] layout), fetched with two XLU rolls; V columns have
    # cos=1 / sin=0 so they pass through untouched.
    half = d // 2
    ahead = pltpu.roll(qkv, qkv_w - half, axis=1)                   # ahead[i]  = qkv[i+half]
    behind = pltpu.roll(qkv, half, axis=1)                          # behind[i] = qkv[i-half]
    qkv3 = qkv.reshape(batch, seq, qkv_w)                           # pure row-split reshape
    ahead3 = ahead.reshape(batch, seq, qkv_w)
    behind3 = behind.reshape(batch, seq, qkv_w)
    qkv3 = (qkv3 * cos_ref[...][None]
            + ahead3 * sina_ref[...][None]
            + behind3 * sinb_ref[...][None])                        # (B, S, 128) f32

    # causal mask (sliding window is a compile-time no-op because window >= seq)
    rows = lax.broadcasted_iota(jnp.int32, (1, seq, seq), 1)
    cols = lax.broadcasted_iota(jnp.int32, (1, seq, seq), 2)
    allowed = cols <= rows
    if window < seq:
        allowed = allowed & ((rows - cols) < window)
    bias = jnp.where(allowed, jnp.float32(0.0), jnp.float32(-1e30))  # (1, S, S)

    k3 = [qkv3[:, :, q_dim + g * d: q_dim + (g + 1) * d].astype(bf16)
          for g in range(kvheads)]                                   # (B, S, D) each
    v3 = [qkv3[:, :, q_dim + kv_dim + g * d: q_dim + kv_dim + (g + 1) * d].astype(bf16)
          for g in range(kvheads)]

    head_outs = []
    for h in range(nheads):                                          # 4 compile-time iters
        g = h // group                                               # GQA: kv head = h // group
        q3 = qkv3[:, :, h * d:(h + 1) * d].astype(bf16)              # (B, S, D)
        s = jnp.einsum('bqd,bkd->bqk', q3, k3[g],
                       preferred_element_type=f32) + bias            # (B, S, S)
        m = jnp.max(s, axis=-1, keepdims=True)
        p = jnp.exp(s - m)
        den = jnp.sum(p, axis=-1, keepdims=True)
        o = jnp.einsum('bqk,bkd->bqd', p.astype(bf16), v3[g],
                       preferred_element_type=f32)                   # (B, S, D)
        # approx reciprocal on the EUP: small relative error vs the exact PyTorch divide.
        head_outs.append(o * pl.reciprocal(den, approx=True))
    attn = jnp.concatenate(head_outs, axis=-1).reshape(n, q_dim)     # (N, 64)

    x = x + jnp.dot(attn.astype(bf16), wo_ref[...], preferred_element_type=f32)

    # --- feed-forward sub-layer (SwiGLU, zero-padded hidden) ---
    xn = _rms(x, ffln_ref[...], eps, emb_true)
    hmat = jnp.dot(xn.astype(bf16), w1_ref[...], preferred_element_type=f32)  # (N, 2*hidden)
    gate = hmat[:, :hidden_pad]
    up = hmat[:, hidden_pad:]
    act = gate * jax.nn.sigmoid(gate) * up                                     # f32 SiLU * up
    x = x + jnp.dot(act.astype(bf16), w2_ref[...], preferred_element_type=f32)

    x_sc[...] = x

    # --- final RMSNorm + LM head, only on the last layer ---
    @pl.when(layer == pl.num_programs(0) - 1)
    def _():
        xf = _rms(x, dn_ref[...], eps, emb_true)
        o_ref[...] = jnp.dot(xf.astype(bf16), head_ref[...],
                             preferred_element_type=f32).astype(o_ref.dtype)


# ---------------- RoPE tables (glue; per-head [evens|odds] layout, V pass-through) ----------------

def rope_tables(seq_len):
    d = HEAD_DIM
    inv_freq = 1.0 / (ROPE_BASE ** (jnp.arange(0, d, 2, dtype=jnp.float32) / d))
    t = jnp.arange(seq_len, dtype=jnp.float32)
    fr = jnp.outer(t, inv_freq)                                      # (S, D/2)
    zero = jnp.zeros_like(fr)
    cos_h = jnp.concatenate([jnp.cos(fr), jnp.cos(fr)], axis=-1)     # (S, D) [firsts|seconds]
    sa_h = jnp.concatenate([-jnp.sin(fr), zero], axis=-1)            # -sin on firsts
    sb_h = jnp.concatenate([zero, jnp.sin(fr)], axis=-1)             # +sin on seconds
    ones_v = jnp.ones((seq_len, KV_DIM), jnp.float32)
    zeros_v = jnp.zeros((seq_len, KV_DIM), jnp.float32)
    cos = jnp.concatenate([jnp.tile(cos_h, (1, NHEADS)),
                           jnp.tile(cos_h, (1, KVHEADS)), ones_v], axis=-1)
    sina = jnp.concatenate([jnp.tile(sa_h, (1, NHEADS)),
                            jnp.tile(sa_h, (1, KVHEADS)), zeros_v], axis=-1)
    sinb = jnp.concatenate([jnp.tile(sb_h, (1, NHEADS)),
                            jnp.tile(sb_h, (1, KVHEADS)), zeros_v], axis=-1)
    return cos, sina, sinb                                           # each (S, 128)


# ---------------- parameters ----------------

def init_params(key):
    ks = jax.random.split(key, 2 + NLAYERS)
    std = 0.02

    emb = jax.random.normal(ks[0], (VOCAB, EMB), jnp.float32) * (EMB ** -0.5)
    emb = emb.at[VOCAB + PAD_ID].set(0.0)  # padding_idx row zeroed
    head = jax.random.normal(ks[1], (EMB, VOCAB), jnp.float32) / math.sqrt(
        math.sqrt(EMB * VOCAB))

    layers = []
    for i in range(NLAYERS):
        lk = jax.random.split(ks[2 + i], 4)
        layers.append({
            "ln_w": jnp.ones((EMB,), jnp.float32),
            "ff_ln_w": jnp.ones((EMB,), jnp.float32),
            "wqkv": jax.random.normal(lk[0], (EMB, QKV_DIM), jnp.float32) * std,
            "wo": jax.random.normal(lk[1], (Q_DIM, EMB), jnp.float32) * std,
            "w1_fused": jax.random.normal(lk[2], (EMB, 2 * HIDDEN), jnp.float32) * std,
            "w2": jax.random.normal(lk[3], (HIDDEN, EMB), jnp.float32) * std,
        })
    return {"embedding": emb, "head": head,
            "dec_norm": jnp.ones((EMB,), jnp.float32), "layers": layers}


def _rope_col_perm(n_heads, d):
    # per-head interleaved pairs (0,1),(2,3),... -> contiguous halves [evens | odds]
    perm = []
    for h in range(n_heads):
        base = h * d
        perm += [base + 2 * j for j in range(d // 2)]
        perm += [base + 2 * j + 1 for j in range(d // 2)]
    return jnp.asarray(perm, dtype=jnp.int32)


def prepare_params(params):
    """One-time glue: permute Wq/Wk columns for roll-based RoPE, fold 1/sqrt(head_dim) into
    the Q columns, zero-pad EMB 64->128 and HIDDEN 224->256 (exactly equivalent), cast matmul
    weights to bf16, and stack per-layer weights along a leading layer axis."""
    q_perm = _rope_col_perm(NHEADS, HEAD_DIM)
    k_perm = _rope_col_perm(KVHEADS, HEAD_DIM)
    inv_scale = 1.0 / math.sqrt(HEAD_DIM)
    pad_e = EMB_PAD - EMB
    pad_h = HIDDEN_PAD - HIDDEN

    ln_s, ffln_s, wqkv_s, wo_s, w1_s, w2_s = [], [], [], [], [], []
    for lp in params["layers"]:
        wq = lp["wqkv"][:, :Q_DIM][:, q_perm] * inv_scale
        wk = lp["wqkv"][:, Q_DIM:Q_DIM + KV_DIM][:, k_perm]
        wv = lp["wqkv"][:, Q_DIM + KV_DIM:]
        wqkv_p = jnp.concatenate([wq, wk, wv], axis=1)
        wqkv_p = jnp.pad(wqkv_p, ((0, pad_e), (0, 0))).astype(jnp.bfloat16)    # (128, 128)

        wo_p = jnp.pad(lp["wo"], ((0, 0), (0, pad_e))).astype(jnp.bfloat16)    # (64, 128)

        wg = jnp.pad(lp["w1_fused"][:, :HIDDEN], ((0, pad_e), (0, pad_h)))
        wu = jnp.pad(lp["w1_fused"][:, HIDDEN:], ((0, pad_e), (0, pad_h)))
        w1_p = jnp.concatenate([wg, wu], axis=1).astype(jnp.bfloat16)          # (128, 512)

        w2_p = jnp.pad(lp["w2"], ((0, pad_h), (0, pad_e))).astype(jnp.bfloat16)  # (256, 128)

        ln_s.append(jnp.pad(lp["ln_w"], (0, pad_e)).reshape(1, 1, EMB_PAD))
        ffln_s.append(jnp.pad(lp["ff_ln_w"], (0, pad_e)).reshape(1, 1, EMB_PAD))
        wqkv_s.append(wqkv_p[None])
        wo_s.append(wo_p[None])
        w1_s.append(w1_p[None])
        w2_s.append(w2_p[None])

    return {
        "embedding": jnp.pad(params["embedding"], ((0, 0), (0, pad_e))),        # (V, 128)
        "head": jnp.pad(params["head"], ((0, pad_e), (0, 0))).astype(jnp.bfloat16),  # (128, V)
        "dec_norm": jnp.pad(params["dec_norm"], (0, pad_e)).reshape(1, EMB_PAD),
        "ln_w": jnp.concatenate(ln_s, axis=0),       # (L, 1, 128) f32
        "ff_ln_w": jnp.concatenate(ffln_s, axis=0),  # (L, 1, 128) f32
        "wqkv": jnp.concatenate(wqkv_s, axis=0),     # (L, 128, 128) bf16
        "wo": jnp.concatenate(wo_s, axis=0),         # (L, 64, 128) bf16
        "w1": jnp.concatenate(w1_s, axis=0),         # (L, 128, 512) bf16
        "w2": jnp.concatenate(w2_s, axis=0),         # (L, 256, 128) bf16
    }


# ---------------- full forward (Mistral.forward, use_cache=False, no dropout) ----------------

def mistral_forward(params, ids):
    B, S = ids.shape
    N = B * S
    # embedding gather is glue outside the kernel
    x0 = jnp.take(params["embedding"], ids.reshape(-1), axis=0)     # (N, EMB_PAD) f32
    cos, sina, sinb = rope_tables(S)                                 # (S, 128) each

    kernel = functools.partial(
        _model_kernel, batch=B, seq=S, nheads=NHEADS, kvheads=KVHEADS,
        head_dim=HEAD_DIM, hidden_pad=HIDDEN_PAD, emb_true=EMB,
        eps=NORM_EPS, window=SLIDING_WINDOW)

    grid_spec = pltpu.PrefetchScalarGridSpec(
        num_scalar_prefetch=0,
        grid=(NLAYERS,),
        in_specs=[
            pl.BlockSpec((N, EMB_PAD), lambda l: (0, 0)),                   # x0 (resident)
            pl.BlockSpec((S, QKV_DIM), lambda l: (0, 0)),                   # cos
            pl.BlockSpec((S, QKV_DIM), lambda l: (0, 0)),                   # sin (firsts)
            pl.BlockSpec((S, QKV_DIM), lambda l: (0, 0)),                   # sin (seconds)
            pl.BlockSpec((None, 1, EMB_PAD), lambda l: (l, 0, 0)),          # ln_w[l]
            pl.BlockSpec((None, EMB_PAD, QKV_DIM), lambda l: (l, 0, 0)),    # wqkv[l]
            pl.BlockSpec((None, Q_DIM, EMB_PAD), lambda l: (l, 0, 0)),      # wo[l]
            pl.BlockSpec((None, 1, EMB_PAD), lambda l: (l, 0, 0)),          # ff_ln_w[l]
            pl.BlockSpec((None, EMB_PAD, 2 * HIDDEN_PAD), lambda l: (l, 0, 0)),  # w1[l]
            pl.BlockSpec((None, HIDDEN_PAD, EMB_PAD), lambda l: (l, 0, 0)),      # w2[l]
            pl.BlockSpec((1, EMB_PAD), lambda l: (0, 0)),                   # dec_norm
            pl.BlockSpec((EMB_PAD, VOCAB), lambda l: (0, 0)),               # head
        ],
        out_specs=pl.BlockSpec((N, VOCAB), lambda l: (0, 0)),
        scratch_shapes=[pltpu.VMEM((N, EMB_PAD), jnp.float32)],             # residual carry
    )

    logits = pl.pallas_call(
        kernel,
        grid_spec=grid_spec,
        out_shape=jax.ShapeDtypeStruct((N, VOCAB), jnp.float32),
        compiler_params=pltpu.CompilerParams(dimension_semantics=("arbitrary",)),
    )(x0, cos, sina, sinb,
      params["ln_w"], params["wqkv"], params["wo"], params["ff_ln_w"],
      params["w1"], params["w2"], params["dec_norm"], params["head"])

    return logits.reshape(B, S, VOCAB)


if __name__ == "__main__":
    key = jax.random.PRNGKey(0)
    pkey, ikey = jax.random.split(key)
    params = prepare_params(init_params(pkey))
    ids = jax.random.randint(ikey, (2, 8), 0, VOCAB, dtype=jnp.int32)  # (B=2, S=8)

    out = jax.jit(mistral_forward)(params, ids)
    jax.block_until_ready(out)

    assert out.shape == (2, 8, VOCAB), out.shape
    assert bool(jnp.isfinite(out).all())
    print("KERNEL_OK")
</pallas_src>

<mosaic_0001>
module attributes {stable_mosaic.version = 11 : i64} {
  func.func @_model_kernel(%arg0: i32, %arg1: memref<16x128xf32, #tpu.memory_space<vmem>>, %arg2: memref<8x128xf32, #tpu.memory_space<vmem>>, %arg3: memref<8x128xf32, #tpu.memory_space<vmem>>, %arg4: memref<8x128xf32, #tpu.memory_space<vmem>>, %arg5: memref<1x1x128xf32, #tpu.memory_space<vmem>>, %arg6: memref<1x128x128xbf16, #tpu.memory_space<vmem>>, %arg7: memref<1x64x128xbf16, #tpu.memory_space<vmem>>, %arg8: memref<1x1x128xf32, #tpu.memory_space<vmem>>, %arg9: memref<1x128x512xbf16, #tpu.memory_space<vmem>>, %arg10: memref<1x256x128xbf16, #tpu.memory_space<vmem>>, %arg11: memref<1x128xf32, #tpu.memory_space<vmem>>, %arg12: memref<128x256xbf16, #tpu.memory_space<vmem>>, %arg13: memref<16x256xf32, #tpu.memory_space<vmem>>, %arg14: memref<16x128xf32, #tpu.memory_space<vmem>>) attributes {dimension_semantics = [#tpu.dimension_semantics<arbitrary>], iteration_bounds = array<i64: 2>, scalar_prefetch = 0 : i64, scratch_operands = 1 : i64, tpu.core_type = #tpu.core_type<tc>, window_params = [{pipeline_mode = #tpu.pipeline_mode<synchronous>, transform_indices = @transform_0, window_bounds = array<i64: 16, 128>}, {pipeline_mode = #tpu.pipeline_mode<synchronous>, transform_indices = @transform_1, window_bounds = array<i64: 8, 128>}, {pipeline_mode = #tpu.pipeline_mode<synchronous>, transform_indices = @transform_2, window_bounds = array<i64: 8, 128>}, {pipeline_mode = #tpu.pipeline_mode<synchronous>, transform_indices = @transform_3, window_bounds = array<i64: 8, 128>}, {transform_indices = @transform_4, window_bounds = array<i64: 1, 1, 128>}, {transform_indices = @transform_5, window_bounds = array<i64: 1, 128, 128>}, {transform_indices = @transform_6, window_bounds = array<i64: 1, 64, 128>}, {transform_indices = @transform_7, window_bounds = array<i64: 1, 1, 128>}, {transform_indices = @transform_8, window_bounds = array<i64: 1, 128, 512>}, {transform_indices = @transform_9, window_bounds = array<i64: 1, 256, 128>}, {pipeline_mode = #tpu.pipeline_mode<synchronous>, transform_indices = @transform_10, window_bounds = array<i64: 1, 128>}, {pipeline_mode = #tpu.pipeline_mode<synchronous>, transform_indices = @transform_11, window_bounds = array<i64: 128, 256>}, {pipeline_mode = #tpu.pipeline_mode<synchronous>, transform_indices = @transform_12, window_bounds = array<i64: 16, 256>}]} {
    %c0_i32 = arith.constant 0 : i32
    %0 = arith.cmpi eq, %arg0, %c0_i32 : i32
    %1 = arith.extui %0 : i1 to i32
    %c0_i32_0 = arith.constant 0 : i32
    %2 = arith.cmpi ne, %1, %c0_i32_0 : i32
    scf.if %2 {
      %c0_57 = arith.constant 0 : index
      %c0_58 = arith.constant 0 : index
      %166 = vector.load %arg1[%c0_57, %c0_58] : memref<16x128xf32, #tpu.memory_space<vmem>>, vector<16x128xf32>
      %c0_59 = arith.constant 0 : index
      %c0_60 = arith.constant 0 : index
      %167 = vector.load %arg14[%c0_59, %c0_60] : memref<16x128xf32, #tpu.memory_space<vmem>>, vector<16x128xf32>
      tpu.vector_store %arg14[%c0_59, %c0_60], %166 {strides = array<i32>} : memref<16x128xf32, #tpu.memory_space<vmem>>, vector<16x128xf32>,
    } else {
    }
    %c0 = arith.constant 0 : index
    %c0_1 = arith.constant 0 : index
    %3 = vector.load %arg14[%c0, %c0_1] : memref<16x128xf32, #tpu.memory_space<vmem>>, vector<16x128xf32>
    %c0_2 = arith.constant 0 : index
    %c0_3 = arith.constant 0 : index
    %c0_4 = arith.constant 0 : index
    %4 = vector.load %arg5[%c0_2, %c0_3, %c0_4] : memref<1x1x128xf32, #tpu.memory_space<vmem>>, vector<1x1x128xf32>
    %5 = vector.shape_cast %4 : vector<1x1x128xf32> to vector<1x128xf32>
    %6 = arith.mulf %3, %3 : vector<16x128xf32>
    %cst = arith.constant dense<0.000000e+00> : vector<16xf32>
    %7 = vector.multi_reduction <add>, %6, %cst [1] : vector<16x128xf32> to vector<16xf32>
    %8 = vector.shape_cast %7 : vector<16xf32> to vector<16x1xf32>
    %cst_5 = arith.constant 1.562500e-02 : f32
    %9 = vector.broadcast %cst_5 : f32 to vector<16x1xf32>
    %10 = arith.mulf %8, %9 : vector<16x1xf32>
    %cst_6 = arith.constant 9.99999974E-6 : f32
    %11 = vector.broadcast %cst_6 : f32 to vector<16x1xf32>
    %12 = arith.addf %10, %11 : vector<16x1xf32>
    %13 = math.rsqrt %12 : vector<16x1xf32>
    %14 = vector.broadcast %13 : vector<16x1xf32> to vector<16x128xf32>
    %15 = arith.mulf %3, %14 : vector<16x128xf32>
    %16 = vector.broadcast %5 : vector<1x128xf32> to vector<16x128xf32>
    %17 = arith.mulf %15, %16 : vector<16x128xf32>
    %18 = arith.truncf %17 : vector<16x128xf32> to vector<16x128xbf16>
    %c0_7 = arith.constant 0 : index
    %c0_8 = arith.constant 0 : index
    %c0_9 = arith.constant 0 : index
    %19 = vector.load %arg6[%c0_7, %c0_8, %c0_9] : memref<1x128x128xbf16, #tpu.memory_space<vmem>>, vector<1x128x128xbf16>
    %20 = vector.shape_cast %19 : vector<1x128x128xbf16> to vector<128x128xbf16>
    %cst_10 = arith.constant dense<0.000000e+00> : vector<16x128xf32>
    %21 = tpu.matmul %18, %20, %cst_10 {dimension_numbers = #tpu.dot_dimension_numbers<[1], [0], [0], [1], [0, 0, 1, 1], [], []>} : vector<16x128xbf16>, vector<128x128xbf16>, vector<16x128xf32> -> vector<16x128xf32>
    %c120_i32 = arith.constant 120 : i32
    %22 = tpu.dynamic_rotate %21 by %c120_i32 dim 1 : vector<16x128xf32>, i32 -> vector<16x128xf32>
    %c8_i32 = arith.constant 8 : i32
    %23 = tpu.dynamic_rotate %21 by %c8_i32 dim 1 : vector<16x128xf32>, i32 -> vector<16x128xf32>
    %24 = vector.shape_cast %21 : vector<16x128xf32> to vector<2x8x128xf32>
    %25 = vector.shape_cast %22 : vector<16x128xf32> to vector<2x8x128xf32>
    %26 = vector.shape_cast %23 : vector<16x128xf32> to vector<2x8x128xf32>
    %c0_11 = arith.constant 0 : index
    %c0_12 = arith.constant 0 : index
    %27 = vector.load %arg2[%c0_11, %c0_12] : memref<8x128xf32, #tpu.memory_space<vmem>>, vector<8x128xf32>
    %28 = vector.shape_cast %27 : vector<8x128xf32> to vector<1x8x128xf32>
    %29 = vector.broadcast %28 : vector<1x8x128xf32> to vector<2x8x128xf32>
    %30 = arith.mulf %24, %29 : vector<2x8x128xf32>
    %c0_13 = arith.constant 0 : index
    %c0_14 = arith.constant 0 : index
    %31 = vector.load %arg3[%c0_13, %c0_14] : memref<8x128xf32, #tpu.memory_space<vmem>>, vector<8x128xf32>
    %32 = vector.shape_cast %31 : vector<8x128xf32> to vector<1x8x128xf32>
    %33 = vector.broadcast %32 : vector<1x8x128xf32> to vector<2x8x128xf32>
    %34 = arith.mulf %25, %33 : vector<2x8x128xf32>
    %35 = arith.addf %30, %34 : vector<2x8x128xf32>
    %c0_15 = arith.constant 0 : index
    %c0_16 = arith.constant 0 : index
    %36 = vector.load %arg4[%c0_15, %c0_16] : memref<8x128xf32, #tpu.memory_space<vmem>>, vector<8x128xf32>
    %37 = vector.shape_cast %36 : vector<8x128xf32> to vector<1x8x128xf32>
    %38 = vector.broadcast %37 : vector<1x8x128xf32> to vector<2x8x128xf32>
    %39 = arith.mulf %26, %38 : vector<2x8x128xf32>
    %40 = arith.addf %35, %39 : vector<2x8x128xf32>
    %41 = tpu.iota {dimensions = array<i32: 1>} : vector<1x8x8xi32>
    %42 = tpu.iota {dimensions = array<i32: 2>} : vector<1x8x8xi32>
    %43 = arith.cmpi sle, %42, %41 : vector<1x8x8xi32>
    %cst_17 = arith.constant 0.000000e+00 : f32
    %cst_18 = arith.constant -1.000000e+30 : f32
    %44 = vector.broadcast %cst_17 : f32 to vector<1x8x8xf32>
    %45 = vector.broadcast %cst_18 : f32 to vector<1x8x8xf32>
    %46 = arith.select %43, %44, %45 : vector<1x8x8xi1>, vector<1x8x8xf32>
    %47 = vector.extract_strided_slice %40 {offsets = [0, 0, 64], sizes = [2, 8, 16], strides = [1, 1, 1]} : vector<2x8x128xf32> to vector<2x8x16xf32>
    %48 = arith.truncf %47 : vector<2x8x16xf32> to vector<2x8x16xbf16>
    %49 = vector.extract_strided_slice %40 {offsets = [0, 0, 80], sizes = [2, 8, 16], strides = [1, 1, 1]} : vector<2x8x128xf32> to vector<2x8x16xf32>
    %50 = arith.truncf %49 : vector<2x8x16xf32> to vector<2x8x16xbf16>
    %51 = vector.extract_strided_slice %40 {offsets = [0, 0, 96], sizes = [2, 8, 16], strides = [1, 1, 1]} : vector<2x8x128xf32> to vector<2x8x16xf32>
    %52 = arith.truncf %51 : vector<2x8x16xf32> to vector<2x8x16xbf16>
    %53 = vector.extract_strided_slice %40 {offsets = [0, 0, 112], sizes = [2, 8, 16], strides = [1, 1, 1]} : vector<2x8x128xf32> to vector<2x8x16xf32>
    %54 = arith.truncf %53 : vector<2x8x16xf32> to vector<2x8x16xbf16>
    %55 = vector.extract_strided_slice %40 {offsets = [0, 0, 0], sizes = [2, 8, 16], strides = [1, 1, 1]} : vector<2x8x128xf32> to vector<2x8x16xf32>
    %56 = arith.truncf %55 : vector<2x8x16xf32> to vector<2x8x16xbf16>
    "tpu.trace_start"() <{level = 10 : i32, message = "bqd,bkd->bqk"}> : () -> ()
    %cst_19 = arith.constant dense<0.000000e+00> : vector<2x8x8xf32>
    %57 = tpu.matmul %56, %48, %cst_19 {dimension_numbers = #tpu.dot_dimension_numbers<[2], [2], [1], [1], [0, 0, 0, 1, 1, 1], [0], [0]>} : vector<2x8x16xbf16>, vector<2x8x16xbf16>, vector<2x8x8xf32> -> vector<2x8x8xf32>
    "tpu.trace_stop"() : () -> ()
    %58 = vector.broadcast %46 : vector<1x8x8xf32> to vector<2x8x8xf32>
    %59 = arith.addf %57, %58 : vector<2x8x8xf32>
    %cst_20 = arith.constant dense<0xFF800000> : vector<2x8xf32>
    %60 = vector.multi_reduction <maximumf>, %59, %cst_20 [2] : vector<2x8x8xf32> to vector<2x8xf32>
    %61 = vector.shape_cast %60 : vector<2x8xf32> to vector<2x8x1xf32>
    %62 = vector.broadcast %61 : vector<2x8x1xf32> to vector<2x8x8xf32>
    %63 = arith.subf %59, %62 : vector<2x8x8xf32>
    %64 = math.exp %63 : vector<2x8x8xf32>
    %cst_21 = arith.constant dense<0.000000e+00> : vector<2x8xf32>
    %65 = vector.multi_reduction <add>, %64, %cst_21 [2] : vector<2x8x8xf32> to vector<2x8xf32>
    %66 = vector.shape_cast %65 : vector<2x8xf32> to vector<2x8x1xf32>
    %67 = arith.truncf %64 : vector<2x8x8xf32> to vector<2x8x8xbf16>
    "tpu.trace_start"() <{level = 10 : i32, message = "bqk,bkd->bqd"}> : () -> ()
    %cst_22 = arith.constant dense<0.000000e+00> : vector<2x8x16xf32>
    %68 = tpu.matmul %67, %52, %cst_22 {dimension_numbers = #tpu.dot_dimension_numbers<[2], [1], [1], [2], [0, 0, 0, 1, 1, 2], [0], [0]>} : vector<2x8x8xbf16>, vector<2x8x16xbf16>, vector<2x8x16xf32> -> vector<2x8x16xf32>
    "tpu.trace_stop"() : () -> ()
    %69 = tpu.reciprocal %66 {approx = true} : vector<2x8x1xf32> -> vector<2x8x1xf32>
    %70 = vector.broadcast %69 : vector<2x8x1xf32> to vector<2x8x16xf32>
    %71 = arith.mulf %68, %70 : vector<2x8x16xf32>
    %72 = vector.extract_strided_slice %40 {offsets = [0, 0, 16], sizes = [2, 8, 16], strides = [1, 1, 1]} : vector<2x8x128xf32> to vector<2x8x16xf32>
    %73 = arith.truncf %72 : vector<2x8x16xf32> to vector<2x8x16xbf16>
    "tpu.trace_start"() <{level = 10 : i32, message = "bqd,bkd->bqk"}> : () -> ()
    %cst_23 = arith.constant dense<0.000000e+00> : vector<2x8x8xf32>
    %74 = tpu.matmul %73, %48, %cst_23 {dimension_numbers = #tpu.dot_dimension_numbers<[2], [2], [1], [1], [0, 0, 0, 1, 1, 1], [0], [0]>} : vector<2x8x16xbf16>, vector<2x8x16xbf16>, vector<2x8x8xf32> -> vector<2x8x8xf32>
    "tpu.trace_stop"() : () -> ()
    %75 = vector.broadcast %46 : vector<1x8x8xf32> to vector<2x8x8xf32>
    %76 = arith.addf %74, %75 : vector<2x8x8xf32>
    %cst_24 = arith.constant dense<0xFF800000> : vector<2x8xf32>
    %77 = vector.multi_reduction <maximumf>, %76, %cst_24 [2] : vector<2x8x8xf32> to vector<2x8xf32>
    %78 = vector.shape_cast %77 : vector<2x8xf32> to vector<2x8x1xf32>
    %79 = vector.broadcast %78 : vector<2x8x1xf32> to vector<2x8x8xf32>
    %80 = arith.subf %76, %79 : vector<2x8x8xf32>
    %81 = math.exp %80 : vector<2x8x8xf32>
    %cst_25 = arith.constant dense<0.000000e+00> : vector<2x8xf32>
    %82 = vector.multi_reduction <add>, %81, %cst_25 [2] : vector<2x8x8xf32> to vector<2x8xf32>
    %83 = vector.shape_cast %82 : vector<2x8xf32> to vector<2x8x1xf32>
    %84 = arith.truncf %81 : vector<2x8x8xf32> to vector<2x8x8xbf16>
    "tpu.trace_start"() <{level = 10 : i32, message = "bqk,bkd->bqd"}> : () -> ()
    %cst_26 = arith.constant dense<0.000000e+00> : vector<2x8x16xf32>
    %85 = tpu.matmul %84, %52, %cst_26 {dimension_numbers = #tpu.dot_dimension_numbers<[2], [1], [1], [2], [0, 0, 0, 1, 1, 2], [0], [0]>} : vector<2x8x8xbf16>, vector<2x8x16xbf16>, vector<2x8x16xf32> -> vector<2x8x16xf32>
    "tpu.trace_stop"() : () -> ()
    %86 = tpu.reciprocal %83 {approx = true} : vector<2x8x1xf32> -> vector<2x8x1xf32>
    %87 = vector.broadcast %86 : vector<2x8x1xf32> to vector<2x8x16xf32>
    %88 = arith.mulf %85, %87 : vector<2x8x16xf32>
    %89 = vector.extract_strided_slice %40 {offsets = [0, 0, 32], sizes = [2, 8, 16], strides = [1, 1, 1]} : vector<2x8x128xf32> to vector<2x8x16xf32>
    %90 = arith.truncf %89 : vector<2x8x16xf32> to vector<2x8x16xbf16>
    "tpu.trace_start"() <{level = 10 : i32, message = "bqd,bkd->bqk"}> : () -> ()
    %cst_27 = arith.constant dense<0.000000e+00> : vector<2x8x8xf32>
    %91 = tpu.matmul %90, %50, %cst_27 {dimension_numbers = #tpu.dot_dimension_numbers<[2], [2], [1], [1], [0, 0, 0, 1, 1, 1], [0], [0]>} : vector<2x8x16xbf16>, vector<2x8x16xbf16>, vector<2x8x8xf32> -> vector<2x8x8xf32>
    "tpu.trace_stop"() : () -> ()
    %92 = vector.broadcast %46 : vector<1x8x8xf32> to vector<2x8x8xf32>
    %93 = arith.addf %91, %92 : vector<2x8x8xf32>
    %cst_28 = arith.constant dense<0xFF800000> : vector<2x8xf32>
    %94 = vector.multi_reduction <maximumf>, %93, %cst_28 [2] : vector<2x8x8xf32> to vector<2x8xf32>
    %95 = vector.shape_cast %94 : vector<2x8xf32> to vector<2x8x1xf32>
    %96 = vector.broadcast %95 : vector<2x8x1xf32> to vector<2x8x8xf32>
    %97 = arith.subf %93, %96 : vector<2x8x8xf32>
    %98 = math.exp %97 : vector<2x8x8xf32>
    %cst_29 = arith.constant dense<0.000000e+00> : vector<2x8xf32>
    %99 = vector.multi_reduction <add>, %98, %cst_29 [2] : vector<2x8x8xf32> to vector<2x8xf32>
    %100 = vector.shape_cast %99 : vector<2x8xf32> to vector<2x8x1xf32>
    %101 = arith.truncf %98 : vector<2x8x8xf32> to vector<2x8x8xbf16>
    "tpu.trace_start"() <{level = 10 : i32, message = "bqk,bkd->bqd"}> : () -> ()
    %cst_30 = arith.constant dense<0.000000e+00> : vector<2x8x16xf32>
    %102 = tpu.matmul %101, %54, %cst_30 {dimension_numbers = #tpu.dot_dimension_numbers<[2], [1], [1], [2], [0, 0, 0, 1, 1, 2], [0], [0]>} : vector<2x8x8xbf16>, vector<2x8x16xbf16>, vector<2x8x16xf32> -> vector<2x8x16xf32>
    "tpu.trace_stop"() : () -> ()
    %103 = tpu.reciprocal %100 {approx = true} : vector<2x8x1xf32> -> vector<2x8x1xf32>
    %104 = vector.broadcast %103 : vector<2x8x1xf32> to vector<2x8x16xf32>
    %105 = arith.mulf %102, %104 : vector<2x8x16xf32>
    %106 = vector.extract_strided_slice %40 {offsets = [0, 0, 48], sizes = [2, 8, 16], strides = [1, 1, 1]} : vector<2x8x128xf32> to vector<2x8x16xf32>
    %107 = arith.truncf %106 : vector<2x8x16xf32> to vector<2x8x16xbf16>
    "tpu.trace_start"() <{level = 10 : i32, message = "bqd,bkd->bqk"}> : () -> ()
    %cst_31 = arith.constant dense<0.000000e+00> : vector<2x8x8xf32>
    %108 = tpu.matmul %107, %50, %cst_31 {dimension_numbers = #tpu.dot_dimension_numbers<[2], [2], [1], [1], [0, 0, 0, 1, 1, 1], [0], [0]>} : vector<2x8x16xbf16>, vector<2x8x16xbf16>, vector<2x8x8xf32> -> vector<2x8x8xf32>
    "tpu.trace_stop"() : () -> ()
    %109 = vector.broadcast %46 : vector<1x8x8xf32> to vector<2x8x8xf32>
    %110 = arith.addf %108, %109 : vector<2x8x8xf32>
    %cst_32 = arith.constant dense<0xFF800000> : vector<2x8xf32>
    %111 = vector.multi_reduction <maximumf>, %110, %cst_32 [2] : vector<2x8x8xf32> to vector<2x8xf32>
    %112 = vector.shape_cast %111 : vector<2x8xf32> to vector<2x8x1xf32>
    %113 = vector.broadcast %112 : vector<2x8x1xf32> to vector<2x8x8xf32>
    %114 = arith.subf %110, %113 : vector<2x8x8xf32>
    %115 = math.exp %114 : vector<2x8x8xf32>
    %cst_33 = arith.constant dense<0.000000e+00> : vector<2x8xf32>
    %116 = vector.multi_reduction <add>, %115, %cst_33 [2] : vector<2x8x8xf32> to vector<2x8xf32>
    %117 = vector.shape_cast %116 : vector<2x8xf32> to vector<2x8x1xf32>
    %118 = arith.truncf %115 : vector<2x8x8xf32> to vector<2x8x8xbf16>
    "tpu.trace_start"() <{level = 10 : i32, message = "bqk,bkd->bqd"}> : () -> ()
    %cst_34 = arith.constant dense<0.000000e+00> : vector<2x8x16xf32>
    %119 = tpu.matmul %118, %54, %cst_34 {dimension_numbers = #tpu.dot_dimension_numbers<[2], [1], [1], [2], [0, 0, 0, 1, 1, 2], [0], [0]>} : vector<2x8x8xbf16>, vector<2x8x16xbf16>, vector<2x8x16xf32> -> vector<2x8x16xf32>
    "tpu.trace_stop"() : () -> ()
    %120 = tpu.reciprocal %117 {approx = true} : vector<2x8x1xf32> -> vector<2x8x1xf32>
    %121 = vector.broadcast %120 : vector<2x8x1xf32> to vector<2x8x16xf32>
    %122 = arith.mulf %119, %121 : vector<2x8x16xf32>
    %123 = tpu.concatenate %71, %88, %105, %122 in 2 : vector<2x8x16xf32>, vector<2x8x16xf32>, vector<2x8x16xf32>, vector<2x8x16xf32> -> vector<2x8x64xf32>
    %124 = vector.shape_cast %123 : vector<2x8x64xf32> to vector<16x64xf32>
    %125 = arith.truncf %124 : vector<16x64xf32> to vector<16x64xbf16>
    %c0_35 = arith.constant 0 : index
    %c0_36 = arith.constant 0 : index
    %c0_37 = arith.constant 0 : index
    %126 = vector.load %arg7[%c0_35, %c0_36, %c0_37] : memref<1x64x128xbf16, #tpu.memory_space<vmem>>, vector<1x64x128xbf16>
    %127 = vector.shape_cast %126 : vector<1x64x128xbf16> to vector<64x128xbf16>
    %cst_38 = arith.constant dense<0.000000e+00> : vector<16x128xf32>
    %128 = tpu.matmul %125, %127, %cst_38 {dimension_numbers = #tpu.dot_dimension_numbers<[1], [0], [0], [1], [0, 0, 1, 1], [], []>} : vector<16x64xbf16>, vector<64x128xbf16>, vector<16x128xf32> -> vector<16x128xf32>
    %129 = arith.addf %3, %128 : vector<16x128xf32>
    %c0_39 = arith.constant 0 : index
    %c0_40 = arith.constant 0 : index
    %c0_41 = arith.constant 0 : index
    %130 = vector.load %arg8[%c0_39, %c0_40, %c0_41] : memref<1x1x128xf32, #tpu.memory_space<vmem>>, vector<1x1x128xf32>
    %131 = vector.shape_cast %130 : vector<1x1x128xf32> to vector<1x128xf32>
    %132 = arith.mulf %129, %129 : vector<16x128xf32>
    %cst_42 = arith.constant dense<0.000000e+00> : vector<16xf32>
    %133 = vector.multi_reduction <add>, %132, %cst_42 [1] : vector<16x128xf32> to vector<16xf32>
    %134 = vector.shape_cast %133 : vector<16xf32> to vector<16x1xf32>
    %cst_43 = arith.constant 1.562500e-02 : f32
    %135 = vector.broadcast %cst_43 : f32 to vector<16x1xf32>
    %136 = arith.mulf %134, %135 : vector<16x1xf32>
    %cst_44 = arith.constant 9.99999974E-6 : f32
    %137 = vector.broadcast %cst_44 : f32 to vector<16x1xf32>
    %138 = arith.addf %136, %137 : vector<16x1xf32>
    %139 = math.rsqrt %138 : vector<16x1xf32>
    %140 = vector.broadcast %139 : vector<16x1xf32> to vector<16x128xf32>
    %141 = arith.mulf %129, %140 : vector<16x128xf32>
    %142 = vector.broadcast %131 : vector<1x128xf32> to vector<16x128xf32>
    %143 = arith.mulf %141, %142 : vector<16x128xf32>
    %144 = arith.truncf %143 : vector<16x128xf32> to vector<16x128xbf16>
    %c0_45 = arith.constant 0 : index
    %c0_46 = arith.constant 0 : index
    %c0_47 = arith.constant 0 : index
    %145 = vector.load %arg9[%c0_45, %c0_46, %c0_47] : memref<1x128x512xbf16, #tpu.memory_space<vmem>>, vector<1x128x512xbf16>
    %146 = vector.shape_cast %145 : vector<1x128x512xbf16> to vector<128x512xbf16>
    %cst_48 = arith.constant dense<0.000000e+00> : vector<16x512xf32>
    %147 = tpu.matmul %144, %146, %cst_48 {dimension_numbers = #tpu.dot_dimension_numbers<[1], [0], [0], [1], [0, 0, 1, 1], [], []>} : vector<16x128xbf16>, vector<128x512xbf16>, vector<16x512xf32> -> vector<16x512xf32>
    %148 = vector.extract_strided_slice %147 {offsets = [0, 0], sizes = [16, 256], strides = [1, 1]} : vector<16x512xf32> to vector<16x256xf32>
    %149 = vector.extract_strided_slice %147 {offsets = [0, 256], sizes = [16, 256], strides = [1, 1]} : vector<16x512xf32> to vector<16x256xf32>
    %150 = arith.negf %148 : vector<16x256xf32>
    %151 = math.exp %150 : vector<16x256xf32>
    %cst_49 = arith.constant 1.000000e+00 : f32
    %152 = vector.broadcast %cst_49 : f32 to vector<16x256xf32>
    %153 = arith.addf %152, %151 : vector<16x256xf32>
    %154 = arith.divf %152, %153 : vector<16x256xf32>
    %155 = arith.mulf %148, %154 : vector<16x256xf32>
    %156 = arith.mulf %155, %149 : vector<16x256xf32>
    %157 = arith.truncf %156 : vector<16x256xf32> to vector<16x256xbf16>
    %c0_50 = arith.constant 0 : index
    %c0_51 = arith.constant 0 : index
    %c0_52 = arith.constant 0 : index
    %158 = vector.load %arg10[%c0_50, %c0_51, %c0_52] : memref<1x256x128xbf16, #tpu.memory_space<vmem>>, vector<1x256x128xbf16>
    %159 = vector.shape_cast %158 : vector<1x256x128xbf16> to vector<256x128xbf16>
    %cst_53 = arith.constant dense<0.000000e+00> : vector<16x128xf32>
    %160 = tpu.matmul %157, %159, %cst_53 {dimension_numbers = #tpu.dot_dimension_numbers<[1], [0], [0], [1], [0, 0, 1, 1], [], []>} : vector<16x256xbf16>, vector<256x128xbf16>, vector<16x128xf32> -> vector<16x128xf32>
    %161 = arith.addf %129, %160 : vector<16x128xf32>
    %c0_54 = arith.constant 0 : index
    %c0_55 = arith.constant 0 : index
    %162 = vector.load %arg14[%c0_54, %c0_55] : memref<16x128xf32, #tpu.memory_space<vmem>>, vector<16x128xf32>
    tpu.vector_store %arg14[%c0_54, %c0_55], %161 {strides = array<i32>} : memref<16x128xf32, #tpu.memory_space<vmem>>, vector<16x128xf32>,
    %c1_i32 = arith.constant 1 : i32
    %163 = arith.cmpi eq, %arg0, %c1_i32 : i32
    %164 = arith.extui %163 : i1 to i32
    %c0_i32_56 = arith.constant 0 : i32
    %165 = arith.cmpi ne, %164, %c0_i32_56 : i32
    scf.if %165 {
      %c0_57 = arith.constant 0 : index
      %c0_58 = arith.constant 0 : index
      %166 = vector.load %arg11[%c0_57, %c0_58] : memref<1x128xf32, #tpu.memory_space<vmem>>, vector<1x128xf32>
      %167 = arith.mulf %161, %161 : vector<16x128xf32>
      %cst_59 = arith.constant dense<0.000000e+00> : vector<16xf32>
      %168 = vector.multi_reduction <add>, %167, %cst_59 [1] : vector<16x128xf32> to vector<16xf32>
      %169 = vector.shape_cast %168 : vector<16xf32> to vector<16x1xf32>
      %cst_60 = arith.constant 1.562500e-02 : f32
      %170 = vector.broadcast %cst_60 : f32 to vector<16x1xf32>
      %171 = arith.mulf %169, %170 : vector<16x1xf32>
      %cst_61 = arith.constant 9.99999974E-6 : f32
      %172 = vector.broadcast %cst_61 : f32 to vector<16x1xf32>
      %173 = arith.addf %171, %172 : vector<16x1xf32>
      %174 = math.rsqrt %173 : vector<16x1xf32>
      %175 = vector.broadcast %174 : vector<16x1xf32> to vector<16x128xf32>
      %176 = arith.mulf %161, %175 : vector<16x128xf32>
      %177 = vector.broadcast %166 : vector<1x128xf32> to vector<16x128xf32>
      %178 = arith.mulf %176, %177 : vector<16x128xf32>
      %179 = arith.truncf %178 : vector<16x128xf32> to vector<16x128xbf16>
      %c0_62 = arith.constant 0 : index
      %c0_63 = arith.constant 0 : index
      %180 = vector.load %arg12[%c0_62, %c0_63] : memref<128x256xbf16, #tpu.memory_space<vmem>>, vector<128x256xbf16>
      %cst_64 = arith.constant dense<0.000000e+00> : vector<16x256xf32>
      %181 = tpu.matmul %179, %180, %cst_64 {dimension_numbers = #tpu.dot_dimension_numbers<[1], [0], [0], [1], [0, 0, 1, 1], [], []>} : vector<16x128xbf16>, vector<128x256xbf16>, vector<16x256xf32> -> vector<16x256xf32>
      %c0_65 = arith.constant 0 : index
      %c0_66 = arith.constant 0 : index
      %182 = vector.load %arg13[%c0_65, %c0_66] : memref<16x256xf32, #tpu.memory_space<vmem>>, vector<16x256xf32>
      tpu.vector_store %arg13[%c0_65, %c0_66], %181 {strides = array<i32>} : memref<16x256xf32, #tpu.memory_space<vmem>>, vector<16x256xf32>,
    } else {
    }
    return
  }
  func.func @transform_0(%arg0: i32) -> (i32, i32) {
    %c0_i32 = arith.constant 0 : i32
    %c0_i32_0 = arith.constant 0 : i32
    %c0_i32_1 = arith.constant 0 : i32
    return %c0_i32, %c0_i32_0 : i32, i32
  }
  func.func @transform_1(%arg0: i32) -> (i32, i32) {
    %c0_i32 = arith.constant 0 : i32
    %c0_i32_0 = arith.constant 0 : i32
    %c0_i32_1 = arith.constant 0 : i32
    return %c0_i32, %c0_i32_0 : i32, i32
  }
  func.func @transform_2(%arg0: i32) -> (i32, i32) {
    %c0_i32 = arith.constant 0 : i32
    %c0_i32_0 = arith.constant 0 : i32
    %c0_i32_1 = arith.constant 0 : i32
    return %c0_i32, %c0_i32_0 : i32, i32
  }
  func.func @transform_3(%arg0: i32) -> (i32, i32) {
    %c0_i32 = arith.constant 0 : i32
    %c0_i32_0 = arith.constant 0 : i32
    %c0_i32_1 = arith.constant 0 : i32
    return %c0_i32, %c0_i32_0 : i32, i32
  }
  func.func @transform_4(%arg0: i32) -> (i32, i32, i32) {
    %c0_i32 = arith.constant 0 : i32
    %c0_i32_0 = arith.constant 0 : i32
    %c0_i32_1 = arith.constant 0 : i32
    return %arg0, %c0_i32, %c0_i32_0 : i32, i32, i32
  }
  func.func @transform_5(%arg0: i32) -> (i32, i32, i32) {
    %c0_i32 = arith.constant 0 : i32
    %c0_i32_0 = arith.constant 0 : i32
    %c0_i32_1 = arith.constant 0 : i32
    return %arg0, %c0_i32, %c0_i32_0 : i32, i32, i32
  }
  func.func @transform_6(%arg0: i32) -> (i32, i32, i32) {
    %c0_i32 = arith.constant 0 : i32
    %c0_i32_0 = arith.constant 0 : i32
    %c0_i32_1 = arith.constant 0 : i32
    return %arg0, %c0_i32, %c0_i32_0 : i32, i32, i32
  }
  func.func @transform_7(%arg0: i32) -> (i32, i32, i32) {
    %c0_i32 = arith.constant 0 : i32
    %c0_i32_0 = arith.constant 0 : i32
    %c0_i32_1 = arith.constant 0 : i32
    return %arg0, %c0_i32, %c0_i32_0 : i32, i32, i32
  }
  func.func @transform_8(%arg0: i32) -> (i32, i32, i32) {
    %c0_i32 = arith.constant 0 : i32
    %c0_i32_0 = arith.constant 0 : i32
    %c0_i32_1 = arith.constant 0 : i32
    return %arg0, %c0_i32, %c0_i32_0 : i32, i32, i32
  }
  func.func @transform_9(%arg0: i32) -> (i32, i32, i32) {
    %c0_i32 = arith.constant 0 : i32
    %c0_i32_0 = arith.constant 0 : i32
    %c0_i32_1 = arith.constant 0 : i32
    return %arg0, %c0_i32, %c0_i32_0 : i32, i32, i32
  }
  func.func @transform_10(%arg0: i32) -> (i32, i32) {
    %c0_i32 = arith.constant 0 : i32
    %c0_i32_0 = arith.constant 0 : i32
    %c0_i32_1 = arith.constant 0 : i32
    return %c0_i32, %c0_i32_0 : i32, i32
  }
  func.func @transform_11(%arg0: i32) -> (i32, i32) {
    %c0_i32 = arith.constant 0 : i32
    %c0_i32_0 = arith.constant 0 : i32
    %c0_i32_1 = arith.constant 0 : i32
    return %c0_i32, %c0_i32_0 : i32, i32
  }
  func.func @transform_12(%arg0: i32) -> (i32, i32) {
    %c0_i32 = arith.constant 0 : i32
    %c0_i32_0 = arith.constant 0 : i32
    %c0_i32_1 = arith.constant 0 : i32
    return %c0_i32, %c0_i32_0 : i32, i32
  }
}

</mosaic_0001>

<bundles_post_ra>
// kernel: tile.34
= control target key start
LH: loop header
LB: loop body
LE: loop exit
PB: predicated region body
PF: predicated region fallthrough
CT: control target
= control target key end

     0   :  { %vm42_vm0 = vcmask 1047556   ;;  %vm44_vm1 = vcmask 130048   ;;  %s93_s22 = smov 16   ;;  %s94_s25 = smov 32   ;;  %vm54_vm2 = vcmask 523648   ;;  %vm64_vm3 = vcmask 392448   ;;  %s146_s0 = inlined_call_operand.vmem [shape: f32[8,4,16], index: 0, kind: input, shape index: {}]   ;;  %s147_s1 = inlined_call_operand.vmem [shape: f32[8,64], index: 1, kind: output, shape index: {}]  }
   0x1   :  { %v82_v0 = vld [vmem:[%s146_s0 + $0x1c] sm:$0xf]  ;;  %v83_v1 = vld [vmem:[%s146_s0 + $0x18] sm:$0xf]  ;;  %v84_v2 = vld [vmem:[%s146_s0 + $0x14] sm:$0xf] }
   0x2   :  { %8 = vst [vmem:[#allocation0 + $0x38] sm:$0xf] %v82_v0  ;;  %13 = vst [vmem:[#allocation0 + $0x30] sm:$0xf] %v83_v1  ;;  %v85_v3 = vld [vmem:[%s146_s0 + $0x10] sm:$0xf] }
   0x3   :  { %18 = vst [vmem:[#allocation0 + $0x28] sm:$0xf] %v84_v2  ;;  %v86_v4 = vld [vmem:[%s146_s0 + $0xc] sm:$0xf]  ;;  %v87_v5 = vld [vmem:[%s146_s0 + $0x8] sm:$0xf] }
   0x4   :  { %23 = vst [vmem:[#allocation0 + $0x20] sm:$0xf] %v85_v3  ;;  %28 = vst [vmem:[#allocation0 + $0x18] sm:$0xf] %v86_v4  ;;  %v88_v6 = vld [vmem:[%s146_s0 + $0x4] sm:$0xf] }
   0x5   :  { %33 = vst [vmem:[#allocation0 + $0x10] sm:$0xf] %v87_v5  ;;  %v38_v7 = vld [vmem:[%s146_s0] sm:$0xf]  ;;  %37 = vst [vmem:[#allocation0 + $0x8] sm:$0xf] %v88_v6 }
   0x6   :  { %39 = vst [vmem:[#allocation0] sm:$0xf] %v38_v7  ;;  %s92_s0 = smov 48   ;;  %vm74_vm4 = vcmask 261248  }
   0xb   :  { %v49_v8 = vld [vmem:[#allocation0 + $0x3] ss:$8 sm:$0xf0]   ;;  %v59_v9 = vld [vmem:[#allocation0 + $0x2] ss:$8 sm:$0xf0]  }
   0xc   :  { %v69_v14 = vld [vmem:[#allocation0 + $0x1] ss:$8 sm:$0xf0]   ;;  %v41_v17 = vld [vmem:[#allocation0] ss:$8 sm:$0xf0]  }
   0xd   :  { %v47_v10 = vld [vmem:[#allocation0 + $0x3] ss:$8 sm:$0xf]   ;;  %v57_v11 = vld [vmem:[#allocation0 + $0x2] ss:$8 sm:$0xf]  }
   0xe   :  { %v51_v12 = vsel %vm42_vm0, %v49_v8, %v47_v10  ;;  %v67_v13 = vld [vmem:[#allocation0 + $0x1] ss:$8 sm:$0xf]   ;;  %v40_v16 = vld [vmem:[#allocation0] ss:$8 sm:$0xf]   ;;  %v61_v18 = vsel %vm42_vm0, %v59_v9, %v57_v11 }
   0xf   :  { %52 = vrot.lane.b32.xlu0 %v51_v12, %s92_s0  ;;  %v71_v15 = vsel %vm42_vm0, %v69_v14, %v67_v13  ;;  %v43_v19 = vsel %vm42_vm0, %v41_v17, %v40_v16 }
  0x10   :  { %72 = vrot.lane.b32.xlu1 %v71_v15, %s93_s22  ;;  %45 = vst.msk [vmem:[%s147_s1] sm:$0xff] %vm44_vm1, %v43_v19  }
  0x13   :  { %62 = vrot.lane.b32.xlu0 %v61_v18, %s94_s25 }
  0x81   :  { %v53_v20 = vpop.permute.xlu0 %52  }
  0x82   :  { %55 = vst.msk [vmem:[%s147_s1] sm:$0xff] %vm54_vm2, %v53_v20   ;;  %v73_v21 = vpop.permute.xlu1 %72  }
  0x85   :  { %v63_v22 = vpop.permute.xlu0 %62  }
  0x86   :  { %65 = vst.msk [vmem:[%s147_s1] sm:$0xff] %vm64_vm3, %v63_v22  }
  0x87   :  { %75 = vst.msk [vmem:[%s147_s1] sm:$0xff] %vm74_vm4, %v73_v21  }

// kernel: tile.39
= control target key start
LH: loop header
LB: loop body
LE: loop exit
PB: predicated region body
PF: predicated region fallthrough
CT: control target
= control target key end

     0   :  { %vm42_vm0 = vcmask 1047556   ;;  %vm44_vm1 = vcmask 130048   ;;  %vm54_vm2 = vcmask 261248   ;;  %s111_s0 = inlined_call_operand.vmem [shape: f32[8,2,16], index: 0, kind: input, shape index: {}]   ;;  %s112_s1 = inlined_call_operand.vmem [shape: f32[8,32], index: 1, kind: output, shape index: {}]  }
   0x1   :  { %v62_v0 = vld [vmem:[%s111_s0 + $0xe] sm:$0x3]  ;;  %v63_v1 = vld [vmem:[%s111_s0 + $0xc] sm:$0x3]  ;;  %v64_v2 = vld [vmem:[%s111_s0 + $0xa] sm:$0x3] }
   0x2   :  { %8 = vst [vmem:[#allocation0 + $0x38] sm:$0x3] %v62_v0  ;;  %13 = vst [vmem:[#allocation0 + $0x30] sm:$0x3] %v63_v1  ;;  %v65_v3 = vld [vmem:[%s111_s0 + $0x8] sm:$0x3] }
   0x3   :  { %18 = vst [vmem:[#allocation0 + $0x28] sm:$0x3] %v64_v2  ;;  %v66_v4 = vld [vmem:[%s111_s0 + $0x6] sm:$0x3]  ;;  %v67_v5 = vld [vmem:[%s111_s0 + $0x4] sm:$0x3] }
   0x4   :  { %23 = vst [vmem:[#allocation0 + $0x20] sm:$0x3] %v65_v3  ;;  %28 = vst [vmem:[#allocation0 + $0x18] sm:$0x3] %v66_v4  ;;  %v68_v6 = vld [vmem:[%s111_s0 + $0x2] sm:$0x3] }
   0x5   :  { %33 = vst [vmem:[#allocation0 + $0x10] sm:$0x3] %v67_v5  ;;  %v38_v7 = vld [vmem:[%s111_s0] sm:$0x3]  ;;  %37 = vst [vmem:[#allocation0 + $0x8] sm:$0x3] %v68_v6 }
   0x6   :  { %39 = vst [vmem:[#allocation0] sm:$0x3] %v38_v7  ;;  %s70_s0 = smov 16  }
   0xb   :  { %v41_v8 = vld [vmem:[#allocation0] ss:$8 sm:$0xf0]   ;;  %v49_v9 = vld [vmem:[#allocation0 + $0x1] ss:$8 sm:$0xf0]  }
   0xd   :  { %v40_v10 = vld [vmem:[#allocation0] ss:$8 sm:$0xf]   ;;  %v47_v11 = vld [vmem:[#allocation0 + $0x1] ss:$8 sm:$0xf]  }
   0xe   :  { %v43_v12 = vsel %vm42_vm0, %v41_v8, %v40_v10  ;;  %v51_v13 = vsel %vm42_vm0, %v49_v9, %v47_v11 }
   0xf   :  { %52 = vrot.lane.b32.xlu0 %v51_v13, %s70_s0  ;;  %45 = vst.msk [vmem:[%s112_s1] sm:$0xff] %vm44_vm1, %v43_v12  }
  0x81   :  { %v53_v14 = vpop.permute.xlu0 %52  }
  0x82   :  { %55 = vst.msk [vmem:[%s112_s1] sm:$0xff] %vm54_vm2, %v53_v14  }

// kernel: mistral_forward.1
= control target key start
LH: loop header
LB: loop body
LE: loop exit
PB: predicated region body
PF: predicated region fallthrough
CT: control target
= control target key end

     0   :  { %s3845_s0 = inlined_call_operand.vmem [shape: f32[16,128], index: 0, kind: input, shape index: {}]   ;;  %s3846_s1 = inlined_call_operand.vmem [shape: f32[8,128], index: 1, kind: input, shape index: {}]   ;;  %s3847_s2 = inlined_call_operand.vmem [shape: f32[8,128], index: 2, kind: input, shape index: {}]   ;;  %s3848_s3 = inlined_call_operand.vmem [shape: f32[8,128], index: 3, kind: input, shape index: {}]   ;;  %s3849_s4 = inlined_call_operand.vmem [shape: f32[2,1,128], index: 4, kind: input, shape index: {}]   ;;  %s3850_s5 = inlined_call_operand.hbm [shape: bf16[2,128,128], index: 5, kind: input, shape index: {}]   ;;  %s3851_s6 = inlined_call_operand.hbm [shape: bf16[2,64,128], index: 6, kind: input, shape index: {}]   ;;  %s3852_s7 = inlined_call_operand.vmem [shape: f32[2,1,128], index: 7, kind: input, shape index: {}]   ;;  %s3853_s8 = inlined_call_operand.vmem [shape: bf16[2,128,512], index: 8, kind: input, shape index: {}]   ;;  %s3854_s9 = inlined_call_operand.vmem [shape: bf16[2,256,128], index: 9, kind: input, shape index: {}]   ;;  %s3855_s10 = inlined_call_operand.vmem [shape: f32[1,128], index: 10, kind: input, shape index: {}]   ;;  %s3856_s11 = inlined_call_operand.hbm [shape: bf16[128,256], index: 11, kind: input, shape index: {}]   ;;  %s3857_s12 = inlined_call_operand.hbm [shape: f32[16,256], index: 12, kind: output, shape index: {}]  }
   0x1   :  { %3865 = sst [smem:[#allocation17_spill]] %s3850_s5 }
   0x2   :  { %3866 = sst [smem:[#allocation18_spill]] %s3855_s10 }
   0x3   :  { %3867 = sst [smem:[#allocation19_spill]] %s3856_s11 }
   0x4   :  { %3868 = sst [smem:[#allocation20_spill]] %s3857_s12 }
   0x5   :  { %17 = vsyncpa [#allocation4], 0 }
   0x6   :  { %19 = vsyncpa [#allocation4 + $0x1], 0 }
   0x7   :  { %20 = vsyncpa [#allocation7], 0 }
   0x8   :  { %22 = vsyncpa [#allocation7 + $0x1], 0 }
   0x9   :  { %23 = vsyncpa [#allocation5], 0  ;;  %s3309_s21 = smov 0   ;;  %s3311_s22 = smov 0  }
   0xa   :  { %s3313_s23 = smov 0   ;;  %s3315_s24 = smov 0  }
   0xb LB: > { %3869 = sst [smem:[#allocation14_spill]] %s3215_s23  ;;  %s3328_s25 = sadd.s32 4294967295, %s3219_s24   ;;  %s3219_s24 = sphi %s3315_s24, %s3887_s24   ;;  %s3215_s23 = sphi %s3313_s23, %s3889_s23   ;;  %s3211_s22 = sphi %s3311_s22, %s3891_s22   ;;  %s3207_s21 = sphi %s3309_s21, %s3890_s21  }
   0xc   : > { %p159_p0 = scmp.ne.s32.totalorder %s3211_s22, %s3207_s21  ;;  %p3859_p1 = scmp.eq.s32.totalorder %s3328_s25, 0 }
   0xd   : > { %p2478_p2 = scmp.ge.s32.totalorder %s3219_s24, 1  ;;  %p337_p3 = scmp.lt.s32.totalorder %s3219_s24, 3 }
   0xe   : > { %p3337_p5 = por %p3859_p1, %p159_p0  ;;  %s3221_s28 = smov [#allocation8]  }
   0xf   : > { %p3341_p6 = pnand %p2478_p2, %p337_p3  ;;  %s364_s29 = sshll.u32 %s3221_s28, 4  ;;  %s365_s29 = int_to_ptr.vmem [resolvable:$true] %s364_s29 }
  0x10   : > { %s3870_s26 = scalar_select %p3337_p5, 1, 0 }
  0x11   : > { %s3871_s27 = scalar_select %p3341_p6, 1, 0 }
  0x12   : > { %p2813_p7 = pneg %p3341_p6  ;;  %s3354_s13 = sadd.s32 1, %s3219_s24  }
  0x13   : > { %3873 = sst [smem:[#allocation15_spill]] %s3354_s13  ;;  %s146_s14 = sadd.s32 1, %s3215_s23 }
  0x14   : > { %p3349_p8 = pnand %p2813_p7, %p3859_p1  ;;  %s143_s15 = ssub.s32 %s3219_s24, %s3354_s13 }
  0x15   : > { %s3874_s11 = sld [smem:[#allocation19_spill]] }
  0x16   : > { %p3061_p10 = pneg %p3349_p8 }
  0x1b   : > { %s3059_s18 = scalar_lea.hbm %s3874_s11, 2048 }
  0x1c   : > { %p3060_p9 = scmp.ne.s32.totalorder %s3874_s11, %s3059_s18  ;;  %p3066_p13 = scmp.lt.u32.totalorder %s3059_s18, %s3874_s11 }
  0x1e   : > { %p3062_p11 = pnand %p3061_p10, %p3060_p9 }
  0x20   : > { %p3063_p12 = pneg %p3062_p11 }
  0x22   : > { %p3068_p0 = pnand %p3066_p13, %p3063_p12 }
  0x24   : > { %3071 = shalt.err (!%p3068_p0)
}
  0x25   : > { %s3072_s12 = scalar_lea.vmem %s365_s29, 2048  ;;  %p3080_p4 = scmp.lt.s32.totalorder %s365_s29, %s365_s29 }
  0x26   : > { %p3073_p2 = scmp.ne.s32.totalorder %s365_s29, %s3072_s12  ;;  %p3081_p1 = scmp.lt.s32.totalorder %s3072_s12, %s3072_s12 }
  0x28   : > { %p3075_p3 = pnand %p3073_p2, %p3061_p10  ;;  %p3082_p5 = por %p3081_p1, %p3080_p4 }
  0x2a   : > { %p3076_p7 = pneg %p3075_p3 }
  0x2c   : > { %p3083_p6 = pnand %p3082_p5, %p3076_p7 }
  0x2e   : > { %3086 = shalt.err (!%p3083_p6)
}
  0x2f   : > { %s3222_s16 = smov 128   ;;  %s3223_s17 = smov 8  }
  0x30   : > { %2816 = dma.hbm_to_vmem [thread:$0]  (!%p3349_p8), %s3874_s11, 2048, %s365_s29, [#allocation7], %s3222_s16, %s3222_s16, %s3223_s17  }
  0x31   : > { %p144_p9 = scmp.eq.s32.totalorder %s143_s15, 0  ;;  %p153_p1 = scmp.ne.s32.totalorder %s3215_s23, %s3211_s22 }
  0x32   : > { %p154_p4 = scmp.eq.s32.totalorder %s3219_s24, 0  ;;  %p2825_p5 = scmp.lt.s32.totalorder %s3219_s24, 2 }
  0x33   : > { %s3380_s12 = scalar_select %p144_p9, %s3215_s23, %s146_s14  }
  0x34   : > { %p155_p6 = por %p154_p4, %p153_p1  ;;  %s3383_s20 = sand.u32 1, %s3215_s23  }
  0x35   : > { %3875 = sst [smem:[#allocation16_spill]] %s3380_s12  ;;  %s2481_s21 = sshll.u32 %s3383_s20, 6 }
  0x36   : > { %s2601_s28 = sshll.u32 %s3219_s24, 10  ;;  %s3876_s5 = sld [smem:[#allocation17_spill]] }
  0x37   : > { %s388_s29 = scalar_lea.vmem [#allocation3], %s2481_s21  ;;  %p3394_p8 = pnand %p2825_p5, %p155_p6 }
  0x38   : > { %s395_s15 = sshll.u32 %s388_s29, 4  ;;  %s385_s17 = scalar_lea.sflag [#allocation4], %s3383_s20  ;;  %s3392_s15 = int_to_ptr.vmem [resolvable:$true] %s395_s15 }
  0x39   : > { %p3089_p11 = pneg %p3394_p8 }
  0x3c   : > { %s3390_s10 = scalar_lea.hbm %s3876_s5, %s2601_s28  ;;  %s3092_s21 = scalar_lea.hbm %s3876_s5, 2048 }
  0x3d   : > { %s3087_s18 = scalar_lea.hbm %s3390_s10, 1024  ;;  %p3093_p0 = scmp.lt.u32.totalorder %s3390_s10, %s3876_s5 }
  0x3e   : > { %p3088_p10 = scmp.ne.s32.totalorder %s3390_s10, %s3087_s18  ;;  %p3094_p2 = scmp.lt.u32.totalorder %s3092_s21, %s3087_s18 }
  0x3f   : > { %p3096_p7 = scmp.lt.u32.totalorder %s3087_s18, %s3390_s10 }
  0x40   : > { %p3090_p12 = pnand %p3089_p11, %p3088_p10  ;;  %p3095_p3 = por %p3094_p2, %p3093_p0 }
  0x42   : > { %p3091_p13 = pneg %p3090_p12  ;;  %p3097_p9 = por %p3096_p7, %p3095_p3 }
  0x44   : > { %p3098_p1 = pnand %p3097_p9, %p3091_p13 }
  0x46   : > { %3101 = shalt.err (!%p3098_p1)
}
  0x47   : > { %s3102_s29 = scalar_lea.vmem %s3392_s15, 1024  ;;  %s3224_s13 = smov [#allocation3]  }
  0x48   : > { %p3103_p4 = scmp.ne.s32.totalorder %s3392_s15, %s3102_s29  ;;  %s3107_s19 = sshll.u32 %s3224_s13, 4  ;;  %s3108_s19 = int_to_ptr.vmem [resolvable:$false] %s3107_s19 }
  0x49   : > { %s3109_s28 = scalar_lea.vmem %s3108_s19, 2048  ;;  %p3110_p10 = scmp.lt.s32.totalorder %s3392_s15, %s3108_s19 }
  0x4a   : > { %p3105_p5 = pnand %p3103_p4, %p3089_p11  ;;  %p3111_p12 = scmp.lt.s32.totalorder %s3109_s28, %s3102_s29 }
  0x4c   : > { %p3106_p6 = pneg %p3105_p5  ;;  %p3112_p0 = por %p3111_p12, %p3110_p10 }
  0x4e   : > { %p3113_p2 = pnand %p3112_p0, %p3106_p6 }
  0x50   : > { %3116 = shalt.err (!%p3113_p2)
}
  0x51   : > { %s3225_s18 = smov 64   ;;  %s3226_s21 = smov 4  }
  0x52   : > { %2820 = dma.hbm_to_vmem [thread:$0]  (!%p3394_p8), %s3390_s10, 1024, %s3392_s15, %s385_s17, %s3225_s18, %s3225_s18, %s3226_s21  }
  0x53   : > { %s2484_s30 = sshll.u32 %s3383_s20, 5  ;;  %s2602_s29 = sshll.u32 %s3219_s24, 9 }
  0x54   : > { %s3435_s28 = scalar_lea.hbm %s3851_s6, %s2602_s29  ;;  %s409_s16 = scalar_lea.vmem [#allocation6], %s2484_s30 }
  0x55   : > { %s416_s5 = sshll.u32 %s409_s16, 4  ;;  %s3878_s11 = sand.u32 1, %s3219_s24   ;;  %s3437_s5 = int_to_ptr.vmem [resolvable:$true] %s416_s5 }
  0x56   : > { %s3441_s12 = scalar_lea.sflag [#allocation7], %s3878_s11  ;;  %s3117_s23 = scalar_lea.hbm %s3435_s28, 512 }
  0x57   : > { %p3118_p13 = scmp.ne.s32.totalorder %s3435_s28, %s3117_s23  ;;  %s3122_s15 = scalar_lea.hbm %s3851_s6, 1024 }
  0x58   : > { %p3123_p9 = scmp.lt.u32.totalorder %s3435_s28, %s3851_s6  ;;  %p3124_p1 = scmp.lt.u32.totalorder %s3122_s15, %s3117_s23 }
  0x59   : > { %p3120_p3 = pnand %p3118_p13, %p3089_p11  ;;  %p3126_p5 = scmp.lt.u32.totalorder %s3117_s23, %s3435_s28 }
  0x5a   : > { %p3125_p4 = por %p3124_p1, %p3123_p9 }
  0x5b   : > { %p3121_p7 = pneg %p3120_p3 }
  0x5c   : > { %p3127_p6 = por %p3126_p5, %p3125_p4 }
  0x5e   : > { %p3128_p10 = pnand %p3127_p6, %p3121_p7 }
  0x60   : > { %3131 = shalt.err (!%p3128_p10)
}
  0x61   : > { %s3132_s11 = scalar_lea.vmem %s3437_s5, 512  ;;  %s3227_s24 = smov [#allocation6]  }
  0x62   : > { %p3133_p12 = scmp.ne.s32.totalorder %s3437_s5, %s3132_s11  ;;  %s3137_s16 = sshll.u32 %s3227_s24, 4  ;;  %s3138_s16 = int_to_ptr.vmem [resolvable:$false] %s3137_s16 }
  0x63   : > { %s3139_s30 = scalar_lea.vmem %s3138_s16, 1024  ;;  %p3140_p13 = scmp.lt.s32.totalorder %s3437_s5, %s3138_s16 }
  0x64   : > { %p3135_p0 = pnand %p3133_p12, %p3089_p11  ;;  %p3141_p3 = scmp.lt.s32.totalorder %s3139_s30, %s3132_s11 }
  0x66   : > { %p3136_p2 = pneg %p3135_p0  ;;  %p3142_p9 = por %p3141_p3, %p3140_p13 }
  0x68   : > { %p3143_p1 = pnand %p3142_p9, %p3136_p2 }
  0x6a   : > { %3146 = shalt.err (!%p3143_p1)
}
  0x6b   : > { %2823 = dma.hbm_to_vmem [thread:$0]  (!%p3394_p8), %s3435_s28, 512, %s3437_s5, %s3441_s12, %s3225_s18, %s3225_s18, %s3226_s21  }
  0x6c   : > { %p3879_p11 = scmp.ne.s32.totalorder %s3871_s27, 0 }
  0x6d   : > { %s452_s23 = sand.u32 (!%p3879_p11), 1, %s3211_s22   ;;  %p3880_p7 = scmp.ne.s32.totalorder (!%p3879_p11), %s3870_s26, 0 }
  0x6e   : > { %450 = sbr.rel (%p3879_p11) target bundleno = 3892 (0xf34), region = 68  ;;  %s2488_s13 = sshll.u32 (!%p3879_p11), %s452_s23, 6 }
  0x6f   : > { %s453_s19 = scalar_lea.sflag (!%p3879_p11), [#allocation4], %s452_s23  ;;  %s3473_s10 = scalar_lea.vmem (!%p3879_p11), [#allocation3], %s2488_s13 }
  0x75   : > { %3190 = dma.done.wait (%p3880_p7), %s453_s19, 1024  }
  0x76   : > { %3192 = vsyncadd (%p3880_p7), %s453_s19, 4294966272  ;;  %s461_s14 = sand.u32 1, %s3328_s25   ;;  %s2489_s20 = sshll.u32 %s452_s23, 5 }
  0x77   : > { %s462_s5 = scalar_lea.sflag [#allocation7], %s461_s14  ;;  %s3480_s12 = scalar_lea.vmem [#allocation6], %s2489_s20 }
  0x78   : > { %3194 = dma.done.wait (%p3880_p7), %s462_s5, 512  }
  0x79   : > { %3196 = vsyncadd (%p3880_p7), %s462_s5, 4294966784  ;;  %p3881_p8 = scmp.eq.s32.totalorder %s3328_s25, 0 }
  0x7b   : > { %3198 = dma.done.wait (%p3881_p8), [#allocation7], 2048   ;;  %p3882_p4 = pmov %p3881_p8 }
  0x7c   : > { %p526_p5 = scmp.lt.s32.totalorder %s3328_s25, 1  ;;  %p3883_p6 = scmp.ne.s32.totalorder %s3328_s25, 0 }
  0x7d   : > { %3200 = vsyncadd (%p3882_p4), [#allocation7], 4294965248  ;;  %v547_v0 = vld [vmem:[%s3845_s0] sm:$0xff] (!%p3883_p6)  ;;  %v548_v1 = vld [vmem:[%s3845_s0 + $0x8] sm:$0xff] (!%p3883_p6) }
  0x7e   : > { %s3492_s27 = scalar_select %p526_p5, %s3328_s25, 1 }
  0x7f   : > { %546 = sbr.rel (%p3883_p6) target bundleno = 134 (0x86), region = 84  ;;  %549 = vst [vmem:[#allocation2] sm:$0xff] (!%p3883_p6), %v547_v0  ;;  %550 = vst [vmem:[#allocation2 + $0x8] sm:$0xff] (!%p3883_p6), %v548_v1 }
  0x80   : > { %s528_s26 = scalar_lea.vmem %s3849_s4, %s3492_s27  ;;  %s531_s17 = scalar_lea.vmem %s3852_s7, %s3492_s27 }
  0x81   : > { %s2603_s29 = sshll.u32 %s3492_s27, 8  ;;  %s2604_s11 = sshll.u32 %s3492_s27, 7 }
  0x82   : > { %s3507_s30 = scalar_lea.vmem %s3853_s8, %s2603_s29  ;;  %s3512_s19 = scalar_lea.vmem %s3854_s9, %s2604_s11 }
  0x86 PF: > { %v551_v2 = vld [vmem:[#allocation2] sm:$0xff]  ;;  %v552_v3 = vld [vmem:[#allocation2 + $0x8] sm:$0xff]  ;;  %v3228_v5 = vmov 0.0   ;;  %v2897_v6 = vld [vmem:[%s3473_s10] sm:$0xff]   ;;  %vm3229_vm0 = vmmov 0   ;;  %s3231_s15 = smov 8   ;;  %v703_v56 = vlaneseq }
  0x87   : > { %v554_v4 = vmul.f32 %v551_v2, %v551_v2  ;;  %2673 = vmatprep.subr.bf16.mxu0 %v3228_v5  ;;  %2699 = vmatprep.subr.bf16.mxu1 %v3228_v5  ;;  %v2898_v7 = vld [vmem:[%s3473_s10 + $0x8] sm:$0xff]   ;;  %v555_v8 = vmul.f32 %v552_v3, %v552_v3  ;;  %v2899_v9 = vld [vmem:[%s3473_s10 + $0x10] sm:$0xff]   ;;  %v2900_v10 = vld [vmem:[%s3473_s10 + $0x18] sm:$0xff]   ;;  %s3232_s13 = smov 64   ;;  %vm714_vm1 = vcmask 130048   ;;  %vm810_vm3 = vcmask 64512  }
  0x88   : > { %2674 = vmatpush3.bf16.msra.mxu0 %v2897_v6  ;;  %v2901_v11 = vld [vmem:[%s3473_s10 + $0x20] sm:$0xff]   ;;  %v2902_v12 = vld [vmem:[%s3473_s10 + $0x28] sm:$0xff]   ;;  %2689 = vmatprep.mubr.msk.bf16.mxu0 %vm3229_vm0, %v3228_v5  ;;  %v2903_v13 = vld [vmem:[%s3473_s10 + $0x30] sm:$0xff]   ;;  %v704_v57 = vshrl.u32 %v703_v56, 7  ;;  %v706_v58 = vand.u32 127, %v703_v56  ;;  %s3234_s14 = smov 32  }
  0x89   : > { %556 = vadd.xlane.f32.xlu0 %v554_v4  ;;  %2675 = vmatprep.subr.bf16.mxu0 %v3228_v5  ;;  %v2904_v14 = vld [vmem:[%s3473_s10 + $0x38] sm:$0xff]   ;;  %v2496_v24 = vld [vmem:[%s528_s26] ss:$0 sm:$0xff]  ;;  %s3230_s10 = smov 120   ;;  %v3233_v59 = vmov -1e+30  }
  0x8a   : > { %2701 = vmatprep.mubr.msk.bf16.mxu1 %vm3229_vm0, %v3228_v5  ;;  %v693_v33 = vld [vmem:[%s3847_s2] sm:$0xff]  ;;  %vm707_vm2 = vcmp.le.s32.totalorder %v706_v58, %v704_v57  ;;  %s3235_s20 = smov 112   ;;  %vm836_vm4 = vcmask 1043456   ;;  %s3236_s5 = smov 48   ;;  %vm1578_vm5 = vcmask 261120   ;;  %vm1581_vm6 = vcmask 392192  }
  0x8b   : > { %v690_v34 = vld [vmem:[%s3846_s1] sm:$0xff]  ;;  %v3582_v60 = vsel %vm707_vm2, 0.0, %v3233_v59  ;;  %s3237_s18 = smov 96   ;;  %s3238_s21 = smov 16   ;;  %vm1617_vm7 = vcmask 523264  }
  0x8c   : > { %2676 = vmatpush3.bf16.msra.mxu0 %v2898_v7  ;;  %v698_v38 = vld [vmem:[%s3848_s3] sm:$0xff]  ;;  %s3239_s28 = smov 80   ;;  %p2579_p10 = scmp.ne.s32.totalorder %s3328_s25, 1 }
  0x8d   : > { %558 = vadd.xlane.f32.xlu0 %v555_v8  ;;  %2677 = vmatprep.subr.bf16.mxu0 %v3228_v5 }
  0x90   : > { %2678 = vmatpush3.bf16.msra.mxu0 %v2899_v9 }
  0x91   : > { %2679 = vmatprep.subr.bf16.mxu0 %v3228_v5 }
  0x94   : > { %2680 = vmatpush3.bf16.msra.mxu0 %v2900_v10 }
  0x95   : > { %2681 = vmatprep.subr.bf16.mxu0 %v3228_v5 }
  0x98   : > { %2682 = vmatpush3.bf16.msra.mxu0 %v2901_v11 }
  0x99   : > { %2683 = vmatprep.subr.bf16.mxu0 %v3228_v5 }
  0x9c   : > { %2684 = vmatpush3.bf16.msra.mxu0 %v2902_v12 }
  0x9d   : > { %2685 = vmatprep.subr.bf16.mxu0 %v3228_v5 }
  0xa0   : > { %2686 = vmatpush3.bf16.msra.mxu0 %v2903_v13 }
  0xa1   : > { %2687 = vmatprep.subr.bf16.mxu0 %v3228_v5 }
  0xa4   : > { %2688 = vmatpush3.bf16.msra.mxu0 %v2904_v14 }
  0xa5   : > { %2693 = vmatprep.subr.bf16.mxu0 %v3228_v5 }
 0x116   : > { %v557_v15 = vpop.xlane.xlu0 %556 }
 0x117   : > { %v560_v16 = vmul.f32 0.015625, %v557_v15 }
 0x119   : > { %v562_v17 = vadd.f32 1e-05, %v560_v16 }
 0x11a   : > { %v559_v18 = vpop.xlane.xlu0 %558 }
 0x11b   : > { %2973 = vrsqrt.f32 %v562_v17  ;;  %v561_v19 = vmul.f32 0.015625, %v559_v18 }
 0x11d   : > { %v563_v20 = vadd.f32 1e-05, %v561_v19 }
 0x11f   : > { %2975 = vrsqrt.f32 %v563_v20 }
 0x125   : > { %v2974_v21 = vpop.eup %2973 }
 0x126   : > { %v566_v22 = vmul.f32 %v2974_v21, %v551_v2 }
 0x128   : > { %v574_v26 = vmul.f32 %v2496_v24, %v566_v22 }
 0x129   : > { %v2976_v23 = vpop.eup %2975 }
 0x12a   : > { %v567_v25 = vmul.f32 %v2976_v23, %v552_v3 }
 0x12c   : > { %v575_v27 = vmul.f32 %v2496_v24, %v567_v25 }
 0x12e   : > { %v576_v28 = vpack.c.bf16 %v575_v27, %v574_v26 }
 0x130   : > { %2690 = vmatmul.mubr.bf16.vlgmr.msra.gmra.mrb[0].mxu0 %v576_v28 }
 0x131   : > { %2695 = vmatprep.mubr.msk.bf16.mxu0 %vm3229_vm0, %v3228_v5 }
 0x203   : > { %v675_v29 = vpop.f32.mrb[0].mxu0 }
 0x204   : > { %682 = vrot.lane.b32.xlu1 %v675_v29, %s3230_s10  ;;  %v2691_v30 = vpop.f32.mrb[1].mxu0  ;;  %v691_v39 = vmul.f32 %v690_v34, %v675_v29 }
 0x205   : > { %v678_v31 = vpop.f32.mrb[2].mxu0 }
 0x206   : > { %684 = vrot.lane.b32.xlu0 %v678_v31, %s3230_s10  ;;  %v2692_v32 = vpop.f32.mrb[3].mxu0  ;;  %v692_v44 = vmul.f32 %v690_v34, %v678_v31 }
 0x208   : > { %686 = vrot.lane.b32.xlu1 %v675_v29, %s3231_s15 }
 0x20c   : > { %688 = vrot.lane.b32.xlu1 %v678_v31, %s3231_s15 }
 0x276   : > { %v683_v35 = vpop.permute.xlu1 %682 }
 0x277   : > { %v694_v36 = vmul.f32 %v693_v33, %v683_v35 }
 0x278   : > { %v685_v37 = vpop.permute.xlu0 %684 }
 0x279   : > { %v696_v41 = vadd.f32 %v694_v36, %v691_v39  ;;  %v695_v42 = vmul.f32 %v693_v33, %v685_v37 }
 0x27a   : > { %v687_v40 = vpop.permute.xlu1 %686 }
 0x27b   : > { %v699_v43 = vmul.f32 %v698_v38, %v687_v40  ;;  %v697_v47 = vadd.f32 %v695_v42, %v692_v44 }
 0x27d   : > { %v701_v45 = vadd.f32 %v699_v43, %v696_v41 }
 0x27e   : > { %v689_v46 = vpop.permute.xlu1 %688 }
 0x27f   : > { %v3560_v48 = vpack.c.bf16 %v701_v45, %v701_v45  ;;  %v700_v49 = vmul.f32 %v698_v38, %v689_v46 }
 0x281   : > { %v702_v50 = vadd.f32 %v700_v49, %v697_v47  ;;  %712 = vrot.lane.b32.xlu1 %v3560_v48, %s3232_s13 }
 0x283   : > { %v3563_v51 = vpack.c.bf16 %v702_v50, %v702_v50 }
 0x285   : > { %762 = vrot.lane.b32.xlu1 %v3563_v51, %s3232_s13 }
 0x2f3   : > { %v713_v52 = vpop.permute.xlu1 %712 }
 0x2f4   : > { %v719_v53 = vsel %vm714_vm1, %v713_v52, 0 }
 0x2f5   : > { %2694 = vmatpush3.bf16.xpose.msra.mxu0 %v719_v53 }
 0x2f6   : > { %2717 = vmatprep.subr.bf16.mxu0 %v3228_v5 }
 0x2f7   : > { %v763_v54 = vpop.permute.xlu1 %762 }
 0x2f8   : > { %v3569_v55 = vsel %vm714_vm1, %v763_v54, 0 }
 0x2f9   : > { %2700 = vmatpush3.bf16.xpose.msra.mxu1 %v3569_v55 }
 0x2fa   : > { %2705 = vmatprep.subr.bf16.mxu1 %v3228_v5 }
 0x2fc   : > { %2696 = vmatmul.mubr.msk.bf16.vlgmr.msra.gmra.mrb[4].mxu0 %vm714_vm1, %v3560_v48 }
 0x2fd   : > { %2718 = vmatpush3.bf16.xpose.msra.mxu0 %v719_v53  ;;  %2719 = vmatprep.mubr.msk.bf16.mxu0 %vm3229_vm0, %v3228_v5 }
 0x2fe   : > { %2729 = vmatprep.subr.bf16.mxu0 %v3228_v5 }
 0x300   : > { %2702 = vmatmul.mubr.msk.bf16.vlgmr.msra.gmra.mrb[0].mxu1 %vm714_vm1, %v3563_v51 }
 0x301   : > { %2707 = vmatprep.mubr.msk.bf16.mxu1 %vm3229_vm0, %v3228_v5 }
 0x3cf   : > { %v755_v61 = vpop.f32.mrb[4].mxu0 }
 0x3d0   : > { %v756_v62 = vadd.f32 %v755_v61, %v3582_v60  ;;  %v2697_v63 = vpop.f32.mrb[5].mxu0 }
 0x3d1   : > { %v758_v0 = vpop.f32.mrb[6].mxu0 }
 0x3d2   : > { %v2698_v1 = vpop.f32.mrb[7].mxu0  ;;  %v811_v2 = vsel %vm810_vm3, %v756_v62, -inf }
 0x3d3   : > { %v804_v3 = vpop.f32.mrb[0].mxu1  ;;  %812 = vmax.xlane.f32.xlu1 %v811_v2 }
 0x3d4   : > { %v805_v4 = vadd.f32 %v804_v3, %v3582_v60  ;;  %v2703_v6 = vpop.f32.mrb[1].mxu1 }
 0x3d5   : > { %v807_v7 = vpop.f32.mrb[2].mxu1 }
 0x3d6   : > { %v2704_v8 = vpop.f32.mrb[3].mxu1  ;;  %v814_v9 = vsel %vm810_vm3, %v805_v4, -inf }
 0x3d7   : > { %815 = vmax.xlane.f32.xlu0 %v814_v9 }
 0x3e4   : > { %831 = vrot.lane.b32.xlu1 %v3560_v48, %s3234_s14 }
 0x3e8   : > { %932 = vrot.lane.b32.xlu1 %v3560_v48, %s3235_s20 }
 0x3ec   : > { %977 = vrot.lane.b32.xlu1 %v3563_v51, %s3235_s20 }
 0x3ed   : > { %880 = vrot.lane.b32.xlu0 %v3563_v51, %s3234_s14 }
 0x460   : > { %v813_v10 = vpop.xlane.xlu1 %812 }
 0x461   : > { %v817_v11 = vsub.f32 %v756_v62, %v813_v10 }
 0x463   : > { %v819_v12 = vmul.f32 1.442695, %v817_v11 }
 0x464   : > { %v816_v13 = vpop.xlane.xlu0 %815  ;;  %v832_v14 = vpop.permute.xlu1 %831 }
 0x465   : > { %2977 = vpow2.f32 %v819_v12  ;;  %v818_v15 = vsub.f32 %v805_v4, %v816_v13  ;;  %v838_v16 = vsel %vm836_vm4, %v832_v14, 0 }
 0x466   : > { %2706 = vmatpush3.bf16.msra.mxu1 %v838_v16 }
 0x467   : > { %v821_v17 = vmul.f32 1.442695, %v818_v15  ;;  %2711 = vmatprep.subr.bf16.mxu1 %v3228_v5 }
 0x468   : > { %v933_v18 = vpop.permute.xlu1 %932  ;;  %v881_v20 = vpop.permute.xlu0 %880 }
 0x469   : > { %2720 = vmatmul.mubr.msk.bf16.vlgmr.msra.gmra.mrb[8].mxu0 %vm714_vm1, %v933_v18  ;;  %2979 = vpow2.f32 %v821_v17  ;;  %v886_v22 = vsel %vm836_vm4, %v881_v20, 0 }
 0x46a   : > { %2730 = vmatpush3.bf16.msra.mxu0 %v838_v16  ;;  %2731 = vmatprep.mubr.msk.bf16.mxu0 %vm3229_vm0, %v3228_v5 }
 0x46b   : > { %2741 = vmatprep.subr.bf16.mxu0 %v3228_v5 }
 0x46c   : > { %v978_v25 = vpop.permute.xlu1 %977 }
 0x46f   : > { %v3600_v19 = vpop.eup %2977 }
 0x470   : > { %v829_v21 = vpack.c.bf16 %v3600_v19, %v3600_v19 }
 0x472   : > { %2708 = vmatmul.mubr.msk.bf16.vlgmr.msra.gmra.mrb[4].mxu1 %vm810_vm3, %v829_v21 }
 0x473   : > { %2712 = vmatpush3.bf16.msra.mxu1 %v886_v22  ;;  %2713 = vmatprep.mubr.msk.bf16.mxu1 %vm3229_vm0, %v3228_v5  ;;  %v3609_v23 = vpop.eup %2979 }
 0x474   : > { %2723 = vmatprep.subr.bf16.mxu1 %v3228_v5  ;;  %v830_v24 = vpack.c.bf16 %v3609_v23, %v3609_v23 }
 0x47a   : > { %2714 = vmatmul.mubr.msk.bf16.vlgmr.msra.gmra.mrb[8].mxu1 %vm810_vm3, %v830_v24 }
 0x47b   : > { %2725 = vmatprep.mubr.msk.bf16.mxu1 %vm3229_vm0, %v3228_v5 }
 0x47c   : > { %2724 = vmatpush3.bf16.xpose.msra.mxu1 %v3569_v55 }
 0x47d   : > { %2735 = vmatprep.subr.bf16.mxu1 %v3228_v5 }
 0x483   : > { %2726 = vmatmul.mubr.msk.bf16.vlgmr.msra.gmra.mrb[12].mxu1 %vm714_vm1, %v978_v25 }
 0x484   : > { %2736 = vmatpush3.bf16.msra.mxu1 %v886_v22  ;;  %2737 = vmatprep.mubr.msk.bf16.mxu1 %vm3229_vm0, %v3228_v5 }
 0x485   : > { %2747 = vmatprep.subr.bf16.mxu1 %v3228_v5 }
 0x53c   : > { %v971_v26 = vpop.f32.mrb[8].mxu0 }
 0x53d   : > { %v972_v27 = vadd.f32 %v971_v26, %v3582_v60  ;;  %v2721_v28 = vpop.f32.mrb[9].mxu0 }
 0x53e   : > { %v974_v29 = vpop.f32.mrb[10].mxu0 }
 0x53f   : > { %v2722_v30 = vpop.f32.mrb[11].mxu0  ;;  %v1022_v31 = vsel %vm810_vm3, %v972_v27, -inf }
 0x540   : > { %1023 = vmax.xlane.f32.xlu1 %v1022_v31 }
 0x545   : > { %v3624_v32 = vpop.f32.mrb[4].mxu1 }
 0x546   : > { %v2709_v33 = vpop.f32.mrb[5].mxu1 }
 0x547   : > { %v877_v34 = vpop.f32.mrb[6].mxu1 }
 0x548   : > { %v2710_v35 = vpop.f32.mrb[7].mxu1 }
 0x54d   : > { %v3626_v36 = vpop.f32.mrb[8].mxu1 }
 0x54e   : > { %v2715_v37 = vpop.f32.mrb[9].mxu1 }
 0x54f   : > { %v925_v38 = vpop.f32.mrb[10].mxu1 }
 0x550   : > { %v2716_v39 = vpop.f32.mrb[11].mxu1 }
 0x551   : > { %1184 = vrot.lane.b32.xlu1 %v3563_v51, %s3236_s5 }
 0x555   : > { %1132 = vrot.lane.b32.xlu1 %v3560_v48, %s3237_s18 }
 0x556   : > { %v1016_v40 = vpop.f32.mrb[12].mxu1 }
 0x557   : > { %v1017_v41 = vadd.f32 %v1016_v40, %v3582_v60  ;;  %v2727_v42 = vpop.f32.mrb[13].mxu1 }
 0x558   : > { %v1019_v43 = vpop.f32.mrb[14].mxu1 }
 0x559   : > { %v2728_v44 = vpop.f32.mrb[15].mxu1  ;;  %v1025_v45 = vsel %vm810_vm3, %v1017_v41, -inf }
 0x55a   : > { %1026 = vmax.xlane.f32.xlu0 %v1025_v45 }
 0x570   : > { %1134 = vrot.lane.b32.xlu0 %v3560_v48, %s3236_s5 }
 0x574   : > { %1182 = vrot.lane.b32.xlu0 %v3563_v51, %s3237_s18 }
 0x5cd   : > { %v1024_v46 = vpop.xlane.xlu1 %1023 }
 0x5ce   : > { %v1028_v47 = vsub.f32 %v972_v27, %v1024_v46 }
 0x5d0   : > { %v1030_v49 = vmul.f32 1.442695, %v1028_v47 }
 0x5d1   : > { %v1185_v58 = vpop.permute.xlu1 %1184 }
 0x5d2   : > { %2981 = vpow2.f32 %v1030_v49  ;;  %v1190_v63 = vsel %vm714_vm1, %v1185_v58, 0 }
 0x5d5   : > { %v1133_v59 = vpop.permute.xlu1 %1132 }
 0x5dc   : > { %v3636_v50 = vpop.eup %2981 }
 0x5dd   : > { %v1040_v52 = vpack.c.bf16 %v3636_v50, %v3636_v50 }
 0x5df   : > { %2732 = vmatmul.mubr.msk.bf16.vlgmr.msra.gmra.mrb[12].mxu0 %vm810_vm3, %v1040_v52 }
 0x5e0   : > { %2743 = vmatprep.mubr.msk.bf16.mxu0 %vm3229_vm0, %v3228_v5 }
 0x5e7   : > { %v1027_v53 = vpop.xlane.xlu0 %1026 }
 0x5e8   : > { %v1029_v54 = vsub.f32 %v1017_v41, %v1027_v53 }
 0x5ea   : > { %v1032_v55 = vmul.f32 1.442695, %v1029_v54 }
 0x5eb   : > { %v1135_v56 = vpop.permute.xlu0 %1134 }
 0x5ec   : > { %2983 = vpow2.f32 %v1032_v55  ;;  %v3644_v57 = vsel %vm714_vm1, %v1135_v56, 0 }
 0x5ed   : > { %2742 = vmatpush3.bf16.xpose.msra.mxu0 %v3644_v57 }
 0x5ee   : > { %2753 = vmatprep.subr.bf16.mxu0 %v3228_v5 }
 0x5ef   : > { %v1183_v0 = vpop.permute.xlu0 %1182 }
 0x5f4   : > { %2744 = vmatmul.mubr.msk.bf16.vlgmr.msra.gmra.mrb[16].mxu0 %vm714_vm1, %v1133_v59 }
 0x5f5   : > { %2755 = vmatprep.mubr.msk.bf16.mxu0 %vm3229_vm0, %v3228_v5 }
 0x5f6   : > { %v3651_v61 = vpop.eup %2983 }
 0x5f7   : > { %v1041_v62 = vpack.c.bf16 %v3651_v61, %v3651_v61 }
 0x5f9   : > { %2738 = vmatmul.mubr.msk.bf16.vlgmr.msra.gmra.mrb[16].mxu1 %vm810_vm3, %v1041_v62 }
 0x5fa   : > { %2748 = vmatpush3.bf16.xpose.msra.mxu1 %v1190_v63  ;;  %2749 = vmatprep.mubr.msk.bf16.mxu1 %vm3229_vm0, %v3228_v5 }
 0x5fb   : > { %2759 = vmatprep.subr.bf16.mxu1 %v3228_v5 }
 0x601   : > { %2750 = vmatmul.mubr.msk.bf16.vlgmr.msra.gmra.mrb[20].mxu1 %vm714_vm1, %v1183_v0 }
 0x602   : > { %2761 = vmatprep.mubr.msk.bf16.mxu1 %vm3229_vm0, %v3228_v5 }
 0x6b2   : > { %v3663_v1 = vpop.f32.mrb[12].mxu0 }
 0x6b3   : > { %v2733_v2 = vpop.f32.mrb[13].mxu0 }
 0x6b4   : > { %v1082_v3 = vpop.f32.mrb[14].mxu0  ;;  %v1037_v2 = vsel %vm810_vm3, %v3651_v61, 0.0 }
 0x6b5   : > { %v2734_v4 = vpop.f32.mrb[15].mxu0  ;;  %v1034_v3 = vsel %vm810_vm3, %v3636_v50, 0.0 }
 0x6c7   : > { %v1176_v6 = vpop.f32.mrb[16].mxu0 }
 0x6c8   : > { %v1177_v7 = vadd.f32 %v1176_v6, %v3582_v60  ;;  %v2745_v8 = vpop.f32.mrb[17].mxu0 }
 0x6c9   : > { %v1179_v9 = vpop.f32.mrb[18].mxu0 }
 0x6ca   : > { %v2746_v10 = vpop.f32.mrb[19].mxu0  ;;  %v1232_v11 = vsel %vm810_vm3, %v1177_v7, -inf }
 0x6cb   : > { %1233 = vmax.xlane.f32.xlu1 %v1232_v11 }
 0x6cc   : > { %v3667_v12 = vpop.f32.mrb[16].mxu1 }
 0x6cd   : > { %v2739_v13 = vpop.f32.mrb[17].mxu1 }
 0x6ce   : > { %v1125_v14 = vpop.f32.mrb[18].mxu1 }
 0x6cf   : > { %v2740_v15 = vpop.f32.mrb[19].mxu1 }
 0x6d4   : > { %v1226_v16 = vpop.f32.mrb[20].mxu1 }
 0x6d5   : > { %v1227_v17 = vadd.f32 %v1226_v16, %v3582_v60  ;;  %v2751_v18 = vpop.f32.mrb[21].mxu1 }
 0x6d6   : > { %v1229_v20 = vpop.f32.mrb[22].mxu1 }
 0x6d7   : > { %v2752_v21 = vpop.f32.mrb[23].mxu1  ;;  %v1235_v22 = vsel %vm810_vm3, %v1227_v17, -inf }
 0x6d8   : > { %1236 = vmax.xlane.f32.xlu0 %v1235_v22 }
 0x6dc   : > { %1300 = vrot.lane.b32.xlu1 %v3563_v51, %s3238_s21 }
 0x6e0   : > { %1352 = vrot.lane.b32.xlu1 %v3560_v48, %s3239_s28 }
 0x6ee   : > { %1252 = vrot.lane.b32.xlu0 %v3560_v48, %s3238_s21 }
 0x6f2   : > { %1397 = vrot.lane.b32.xlu0 %v3563_v51, %s3239_s28 }
 0x758   : > { %v1234_v24 = vpop.xlane.xlu1 %1233 }
 0x759   : > { %v1238_v25 = vsub.f32 %v1177_v7, %v1234_v24  ;;  %v823_v24 = vsel %vm810_vm3, %v3600_v19, 0.0 }
 0x75b   : > { %v1240_v26 = vmul.f32 1.442695, %v1238_v25 }
 0x75c   : > { %v1301_v27 = vpop.permute.xlu1 %1300 }
 0x75d   : > { %v1306_v28 = vsel %vm836_vm4, %v1301_v27, 0  ;;  %2985 = vpow2.f32 %v1240_v26 }
 0x75e   : > { %2760 = vmatpush3.bf16.msra.mxu1 %v1306_v28 }
 0x75f   : > { %2771 = vmatprep.subr.bf16.mxu1 %v3228_v5 }
 0x760   : > { %v1353_v38 = vpop.permute.xlu1 %1352 }
 0x765   : > { %v1237_v29 = vpop.xlane.xlu0 %1236 }
 0x766   : > { %v1239_v30 = vsub.f32 %v1227_v17, %v1237_v29 }
 0x767   : > { %v2986_v33 = vpop.eup %2985 }
 0x768   : > { %v1242_v31 = vmul.f32 1.442695, %v1239_v30  ;;  %v1250_v51 = vpack.c.bf16 %v2986_v33, %v2986_v33  ;;  %v1244_v6 = vsel %vm810_vm3, %v2986_v33, 0.0 }
 0x769   : > { %v1253_v34 = vpop.permute.xlu0 %1252 }
 0x76a   : > { %2987 = vpow2.f32 %v1242_v31  ;;  %v1258_v48 = vsel %vm836_vm4, %v1253_v34, 0  ;;  %v826_v31 = vsel %vm810_vm3, %v3609_v23, 0.0 }
 0x76b   : > { %2754 = vmatpush3.bf16.msra.mxu0 %v1258_v48 }
 0x76c   : > { %2765 = vmatprep.subr.bf16.mxu0 %v3228_v5 }
 0x76d   : > { %v1398_v39 = vpop.permute.xlu0 %1397 }
 0x76e   : > { %2756 = vmatmul.mubr.msk.bf16.vlgmr.msra.gmra.mrb[20].mxu0 %vm810_vm3, %v1250_v51 }
 0x76f   : > { %2767 = vmatprep.mubr.msk.bf16.mxu0 %vm3229_vm0, %v3228_v5 }
 0x774   : > { %v2988_v35 = vpop.eup %2987  ;;  %2766 = vmatpush3.bf16.xpose.msra.mxu0 %v3644_v57 }
 0x775   : > { %v1251_v37 = vpack.c.bf16 %v2988_v35, %v2988_v35  ;;  %2777 = vmatprep.subr.bf16.mxu0 %v3228_v5  ;;  %v1247_v4 = vsel %vm810_vm3, %v2988_v35, 0.0  ;;  %v2908_v35 = vld [vmem:[%s3480_s12 + $0x18] sm:$0xff]  }
 0x777   : > { %2762 = vmatmul.mubr.msk.bf16.vlgmr.msra.gmra.mrb[24].mxu1 %vm810_vm3, %v1251_v37 }
 0x778   : > { %2772 = vmatpush3.bf16.xpose.msra.mxu1 %v1190_v63  ;;  %2773 = vmatprep.mubr.msk.bf16.mxu1 %vm3229_vm0, %v3228_v5 }
 0x779   : > { %2783 = vmatprep.subr.bf16.mxu1 %v3228_v5 }
 0x77b   : > { %2768 = vmatmul.mubr.msk.bf16.vlgmr.msra.gmra.mrb[24].mxu0 %vm714_vm1, %v1353_v38 }
 0x77c   : > { %2778 = vmatpush3.bf16.msra.mxu0 %v1258_v48  ;;  %2779 = vmatprep.mubr.msk.bf16.mxu0 %vm3229_vm0, %v3228_v5  ;;  %v2907_v48 = vld [vmem:[%s3480_s12 + $0x10] sm:$0xff]  }
 0x77d   : > { %2789 = vmatprep.subr.bf16.mxu0 %v3228_v5 }
 0x77f   : > { %2774 = vmatmul.mubr.msk.bf16.vlgmr.msra.gmra.mrb[28].mxu1 %vm714_vm1, %v1398_v39 }
 0x780   : > { %2784 = vmatpush3.bf16.msra.mxu1 %v1306_v28  ;;  %2785 = vmatprep.mubr.msk.bf16.mxu1 %vm3229_vm0, %v3228_v5 }
 0x841   : > { %v3697_v40 = vpop.f32.mrb[20].mxu0 }
 0x842   : > { %v2757_v41 = vpop.f32.mrb[21].mxu0 }
 0x843   : > { %v1297_v42 = vpop.f32.mrb[22].mxu0 }
 0x844   : > { %v2758_v43 = vpop.f32.mrb[23].mxu0 }
 0x84a   : > { %v3699_v44 = vpop.f32.mrb[24].mxu1 }
 0x84b   : > { %v2763_v45 = vpop.f32.mrb[25].mxu1 }
 0x84c   : > { %v1345_v46 = vpop.f32.mrb[26].mxu1 }
 0x84d   : > { %v2764_v47 = vpop.f32.mrb[27].mxu1 }
 0x84e   : > { %v1391_v49 = vpop.f32.mrb[24].mxu0 }
 0x84f   : > { %v1392_v52 = vadd.f32 %v1391_v49, %v3582_v60  ;;  %v2769_v53 = vpop.f32.mrb[25].mxu0 }
 0x850   : > { %v1394_v54 = vpop.f32.mrb[26].mxu0 }
 0x851   : > { %v2770_v55 = vpop.f32.mrb[27].mxu0  ;;  %v1442_v56 = vsel %vm810_vm3, %v1392_v52, -inf }
 0x852   : > { %v1436_v57 = vpop.f32.mrb[28].mxu1  ;;  %1443 = vmax.xlane.f32.xlu1 %v1442_v56 }
 0x853   : > { %v1437_v58 = vadd.f32 %v1436_v57, %v3582_v60  ;;  %v2775_v59 = vpop.f32.mrb[29].mxu1 }
 0x854   : > { %v1439_v62 = vpop.f32.mrb[30].mxu1 }
 0x855   : > { %v2776_v63 = vpop.f32.mrb[31].mxu1  ;;  %v1445_v0 = vsel %vm810_vm3, %v1437_v58, -inf }
 0x856   : > { %1446 = vmax.xlane.f32.xlu0 %v1445_v0  ;;  %1038 = vadd.xlane.f32.xlu1 %v1037_v2 }
 0x85a   : > { %1035 = vadd.xlane.f32.xlu0 %v1034_v3  ;;  %1248 = vadd.xlane.f32.xlu1 %v1247_v4 }
 0x85e   : > { %1245 = vadd.xlane.f32.xlu0 %v1244_v6 }
 0x8df   : > { %v1444_v60 = vpop.xlane.xlu1 %1443 }
 0x8e0   : > { %v1448_v7 = vsub.f32 %v1392_v52, %v1444_v60 }
 0x8e2   : > { %v1450_v8 = vmul.f32 1.442695, %v1448_v7 }
 0x8e3   : > { %v1447_v9 = vpop.xlane.xlu0 %1446  ;;  %v1039_v10 = vpop.xlane.xlu1 %1038 }
 0x8e4   : > { %2989 = vpow2.f32 %v1450_v8  ;;  %v1449_v11 = vsub.f32 %v1437_v58, %v1447_v9 }
 0x8e5   : > { %2991 = vrcp.f32 %v1039_v10 }
 0x8e6   : > { %v1452_v61 = vmul.f32 1.442695, %v1449_v11  ;;  %v2909_v11 = vld [vmem:[%s3507_s30] ss:$16 sps:$4 sm:$0xff]  }
 0x8e7   : > { %v1036_v13 = vpop.xlane.xlu0 %1035  ;;  %v1249_v14 = vpop.xlane.xlu1 %1248 }
 0x8e8   : > { %2993 = vpow2.f32 %v1452_v61  ;;  %v2911_v61 = vld [vmem:[%s3507_s30 + $0x4] ss:$16 sps:$4 sm:$0xff]  }
 0x8e9   : > { %2995 = vrcp.f32 %v1036_v13  ;;  %v2912_v13 = vld [vmem:[%s3507_s30 + $0x8] ss:$16 sps:$4 sm:$0xff]   ;;  %1880 = vmatprep.subr.bf16.mxu1 %v2911_v61  ;;  %v2965_v61 = vld [vmem:[%s3512_s19 + $0x60] sm:$0xff]  }
 0x8ea   : > { %2997 = vrcp.f32 %v1249_v14  ;;  %v2914_v14 = vld [vmem:[%s3507_s30 + $0xc] ss:$16 sps:$4 sm:$0xff]  }
 0x8eb   : > { %v1246_v50 = vpop.xlane.xlu0 %1245 }
 0x8ec   : > { %2999 = vrcp.f32 %v1246_v50  ;;  %v2917_v50 = vld [vmem:[%s3507_s30 + $0x24] ss:$16 sps:$4 sm:$0xff]  }
 0x8ee   : > { %v2990_v15 = vpop.eup %2989 }
 0x8ef   : > { %v1454_v16 = vsel %vm810_vm3, %v2990_v15, 0.0  ;;  %v1460_v17 = vpack.c.bf16 %v2990_v15, %v2990_v15  ;;  %v2992_v18 = vpop.eup %2991  ;;  %v2920_v15 = vld [vmem:[%s3507_s30 + $0x2c] ss:$16 sps:$4 sm:$0xff]  }
 0x8f0   : > { %1455 = vadd.xlane.f32.xlu0 %v1454_v16  ;;  %v1131_v28 = vmul.f32 %v2992_v18, %v3667_v12  ;;  %v2906_v12 = vld [vmem:[%s3480_s12 + $0x8] sm:$0xff]   ;;  %v2915_v16 = vld [vmem:[%s3507_s30 + $0x20] ss:$16 sps:$4 sm:$0xff]   ;;  %v2923_v18 = vld [vmem:[%s3507_s30 + $0x44] ss:$16 sps:$4 sm:$0xff]  }
 0x8f1   : > { %2780 = vmatmul.mubr.msk.bf16.vlgmr.msra.gmra.mrb[28].mxu0 %vm810_vm3, %v1460_v17  ;;  %v2918_v17 = vld [vmem:[%s3507_s30 + $0x28] ss:$16 sps:$4 sm:$0xff]  }
 0x8f2   : > { %v2994_v20 = vpop.eup %2993  ;;  %2797 = vmatprep.mubr.msk.bf16.mxu0 %vm3229_vm0, %v3228_v5 }
 0x8f3   : > { %v2996_v21 = vpop.eup %2995  ;;  %v1457_v22 = vsel %vm810_vm3, %v2994_v20, 0.0  ;;  %v1461_v25 = vpack.c.bf16 %v2994_v20, %v2994_v20  ;;  %v2926_v20 = vld [vmem:[%s3507_s30 + $0x4c] ss:$16 sps:$4 sm:$0xff]  }
 0x8f4   : > { %v2998_v26 = vpop.eup %2997  ;;  %1458 = vadd.xlane.f32.xlu1 %v1457_v22  ;;  %824 = vadd.xlane.f32.xlu0 %v823_v24  ;;  %v1130_v27 = vmul.f32 %v2996_v21, %v3663_v1  ;;  %v2905_v1 = vld [vmem:[%s3480_s12] sm:$0xff]   ;;  %v2924_v22 = vld [vmem:[%s3507_s30 + $0x48] ss:$16 sps:$4 sm:$0xff]  }
 0x8f5   : > { %2786 = vmatmul.mubr.msk.bf16.vlgmr.msra.gmra.mrb[32].mxu1 %vm810_vm3, %v1461_v25  ;;  %v1351_v33 = vmul.f32 %v2998_v26, %v3699_v44  ;;  %2790 = vmatpush3.bf16.msra.mxu0 %v2905_v1  ;;  %v2921_v21 = vld [vmem:[%s3507_s30 + $0x40] ss:$16 sps:$4 sm:$0xff]   ;;  %v2932_v1 = vld [vmem:[%s3507_s30 + $0x6c] ss:$16 sps:$4 sm:$0xff]  }
 0x8f6   : > { %v3000_v29 = vpop.eup %2999  ;;  %v2882_v30 = vpack.i.bf16 %v1131_v28, %v1130_v27  ;;  %2791 = vmatprep.subr.bf16.mxu0 %v3228_v5  ;;  %1881 = vmatpush1.bf16.msra.mxu1 %v2909_v11  ;;  %v3029_v25 = vld [vmem:[#allocation2] sm:$0xff]  ;;  %v2964_v11 = vld [vmem:[%s3512_s19 + $0x18] sm:$0xff]  }
 0x8f7   : > { %v1350_v19 = vmul.f32 %v3000_v29, %v3697_v40  ;;  %1882 = vmatprep.subr.bf16.mxu1 %v2917_v50  ;;  %v3030_v29 = vld [vmem:[#allocation2 + $0x8] sm:$0xff] }
 0x8f8   : > { %827 = vadd.xlane.f32.xlu1 %v826_v31  ;;  %v2968_v50 = vld [vmem:[%s3512_s19 + $0x28] sm:$0xff]  }
 0x8f9   : > { %v2887_v34 = vpack.i.bf16 %v1351_v33, %v1350_v19  ;;  %2792 = vmatpush3.bf16.msra.mxu0 %v2906_v12  ;;  %v2927_v12 = vld [vmem:[%s3507_s30 + $0x60] ss:$16 sps:$4 sm:$0xff]  }
 0x8fa   : > { %2793 = vmatprep.subr.bf16.mxu0 %v3228_v5  ;;  %1883 = vmatpush1.bf16.msra.mxu1 %v2915_v16  ;;  %v2970_v16 = vld [vmem:[%s3512_s19 + $0x30] sm:$0xff]  }
 0x8fb   : > { %1884 = vmatprep.subr.bf16.mxu1 %v2923_v18  ;;  %v2972_v18 = vld [vmem:[%s3512_s19 + $0x38] sm:$0xff]  }
 0x8fd   : > { %2794 = vmatpush3.bf16.msra.mxu0 %v2907_v48  ;;  %v2930_v48 = vld [vmem:[%s3507_s30 + $0x68] ss:$16 sps:$4 sm:$0xff]  }
 0x8fe   : > { %2795 = vmatprep.subr.bf16.mxu0 %v3228_v5  ;;  %1885 = vmatpush1.bf16.msra.mxu1 %v2921_v21 }
 0x901   : > { %2796 = vmatpush3.bf16.msra.mxu0 %v2908_v35  ;;  %v2936_v35 = vld [vmem:[%s3507_s30 + $0x88] ss:$16 sps:$4 sm:$0xff]  }
 0x902   : > { %1923 = vmatprep.subr.bf16.mxu0 %v2914_v14  ;;  %v2967_v14 = vld [vmem:[%s3512_s19 + $0x68] sm:$0xff]  }
 0x909   : > { %2888 = vrot.lane.b32.xlu1 %v2887_v34, %s3234_s14  ;;  %v2929_v34 = vld [vmem:[%s3507_s30 + $0x64] ss:$16 sps:$4 sm:$0xff]  }
 0x90a   : > { %2883 = vrot.lane.b32.xlu0 %v2882_v30, %s3238_s21  ;;  %1886 = vmatprep.subr.bf16.mxu1 %v2929_v34 }
 0x90b   : > { %1887 = vmatpush1.bf16.msra.mxu1 %v2927_v12 }
 0x97d   : > { %v1456_v23 = vpop.xlane.xlu0 %1455 }
 0x97e   : > { %3001 = vrcp.f32 %v1456_v23  ;;  %v2933_v23 = vld [vmem:[%s3507_s30 + $0x80] ss:$16 sps:$4 sm:$0xff]  }
 0x981   : > { %v1459_v51 = vpop.xlane.xlu1 %1458  ;;  %v825_v5 = vpop.xlane.xlu0 %824 }
 0x982   : > { %3003 = vrcp.f32 %v1459_v51  ;;  %v2935_v51 = vld [vmem:[%s3507_s30 + $0x84] ss:$16 sps:$4 sm:$0xff]  }
 0x983   : > { %3005 = vrcp.f32 %v825_v5  ;;  %1888 = vmatprep.subr.bf16.mxu1 %v2935_v51  ;;  %v2954_v5 = vld [vmem:[%s3507_s30 + $0xe8] ss:$16 sps:$4 sm:$0xff]  }
 0x984   : > { %1889 = vmatpush1.bf16.msra.mxu1 %v2933_v23 }
 0x985   : > { %v828_v53 = vpop.xlane.xlu1 %827  ;;  %v2884_v56 = vpop.permute.xlu0 %2883 }
 0x986   : > { %3007 = vrcp.f32 %v828_v53  ;;  %v2886_v62 = vunpack.i.h.bf16 %v2884_v56  ;;  %v2885_v63 = vunpack.i.l.bf16 %v2884_v56 }
 0x988   : > { %v3002_v40 = vpop.eup %3001 }
 0x989   : > { %v2889_v59 = vpop.permute.xlu1 %2888 }
 0x98a   : > { %v2891_v3 = vunpack.i.h.bf16 %v2889_v59  ;;  %v2890_v4 = vunpack.i.l.bf16 %v2889_v59 }
 0x98c   : > { %v3004_v42 = vpop.eup %3003 }
 0x98d   : > { %v3006_v54 = vpop.eup %3005 }
 0x98e   : > { %v930_v57 = vmul.f32 %v3006_v54, %v3624_v32 }
 0x990   : > { %v3008_v55 = vpop.eup %3007  ;;  %v1576_v0 = vsel %vm714_vm1, %v930_v57, %v2885_v63 }
 0x991   : > { %v931_v58 = vmul.f32 %v3008_v55, %v3626_v36  ;;  %v1579_v7 = vsel %vm1578_vm5, %v1576_v0, %v2890_v4  ;;  %v2526_v0 = vld [vmem:[%s531_s17] ss:$0 sm:$0xff] }
 0x993   : > { %v1577_v2 = vsel %vm714_vm1, %v931_v58, %v2886_v62 }
 0x994   : > { %v1580_v60 = vsel %vm1578_vm5, %v1577_v2, %v2891_v3 }
 0x9c4   : > { %v1499_v37 = vpop.f32.mrb[28].mxu0 }
 0x9c5   : > { %v2781_v38 = vpop.f32.mrb[29].mxu0  ;;  %v1550_v44 = vmul.f32 %v3002_v40, %v1499_v37  ;;  %v2938_v37 = vld [vmem:[%s3507_s30 + $0x8c] ss:$16 sps:$4 sm:$0xff]   ;;  %v2939_v40 = vld [vmem:[%s3507_s30 + $0xa0] ss:$16 sps:$4 sm:$0xff]  }
 0x9c6   : > { %v1502_v39 = vpop.f32.mrb[30].mxu0  ;;  %v2941_v38 = vld [vmem:[%s3507_s30 + $0xa4] ss:$16 sps:$4 sm:$0xff]  }
 0x9c7   : > { %v2782_v41 = vpop.f32.mrb[31].mxu0  ;;  %v2944_v39 = vld [vmem:[%s3507_s30 + $0xac] ss:$16 sps:$4 sm:$0xff]   ;;  %1890 = vmatprep.subr.bf16.mxu1 %v2941_v38 }
 0x9c8   : > { %v1542_v43 = vpop.f32.mrb[32].mxu1  ;;  %v2942_v41 = vld [vmem:[%s3507_s30 + $0xa8] ss:$16 sps:$4 sm:$0xff]   ;;  %1891 = vmatpush1.bf16.msra.mxu1 %v2939_v40 }
 0x9c9   : > { %v1551_v45 = vmul.f32 %v3004_v42, %v1542_v43  ;;  %v2787_v46 = vpop.f32.mrb[33].mxu1  ;;  %v2947_v42 = vld [vmem:[%s3507_s30 + $0xc4] ss:$16 sps:$4 sm:$0xff]   ;;  %v2950_v43 = vld [vmem:[%s3507_s30 + $0xcc] ss:$16 sps:$4 sm:$0xff]  }
 0x9ca   : > { %v1545_v47 = vpop.f32.mrb[34].mxu1  ;;  %v2948_v46 = vld [vmem:[%s3507_s30 + $0xc8] ss:$16 sps:$4 sm:$0xff]   ;;  %1892 = vmatprep.subr.bf16.mxu1 %v2947_v42 }
 0x9cb   : > { %v2892_v49 = vpack.i.bf16 %v1551_v45, %v1550_v44  ;;  %v2788_v52 = vpop.f32.mrb[35].mxu1  ;;  %v3240_v44 = vmov 0   ;;  %v2945_v45 = vld [vmem:[%s3507_s30 + $0xc0] ss:$16 sps:$4 sm:$0xff]   ;;  %v2953_v47 = vld [vmem:[%s3507_s30 + $0xe4] ss:$16 sps:$4 sm:$0xff]  }
 0x9cc   : > { %1912 = vmatprep.mubr.bf16.mxu1 %v3240_v44  ;;  %1893 = vmatpush1.bf16.msra.mxu1 %v2945_v45  ;;  %v2951_v52 = vld [vmem:[%s3507_s30 + $0xe0] ss:$16 sps:$4 sm:$0xff]  }
 0x9cd   : > { %2893 = vrot.lane.b32.xlu1 %v2892_v49, %s3236_s5  ;;  %v2956_v49 = vld [vmem:[%s3507_s30 + $0xec] ss:$16 sps:$4 sm:$0xff]   ;;  %1894 = vmatprep.subr.bf16.mxu1 %v2953_v47 }
 0x9d0   : > { %1895 = vmatpush1.bf16.msra.mxu1 %v2951_v52 }
 0xa3f   : > { %v2894_v6 = vpop.permute.xlu1 %2893 }
 0xa40   : > { %v2896_v32 = vunpack.i.h.bf16 %v2894_v6  ;;  %v2895_v36 = vunpack.i.l.bf16 %v2894_v6 }
 0xa42   : > { %v1583_v8 = vsel %vm1581_vm6, %v1580_v60, %v2896_v32  ;;  %v1582_v9 = vsel %vm1581_vm6, %v1579_v7, %v2895_v36  ;;  %v2957_v32 = vld [vmem:[%s3512_s19 + $0x40] sm:$0xff]   ;;  %v2959_v60 = vld [vmem:[%s3512_s19 + $0x48] sm:$0xff]  }
 0xa43   : > { %v1584_v10 = vpack.c.bf16 %v1583_v8, %v1582_v9  ;;  %v2958_v36 = vld [vmem:[%s3512_s19] sm:$0xff]   ;;  %2651 = vmatprep.subr.bf16.mxu1 %v2957_v32  ;;  %v2960_v7 = vld [vmem:[%s3512_s19 + $0x8] sm:$0xff]   ;;  %v2961_v8 = vld [vmem:[%s3512_s19 + $0x50] sm:$0xff]  }
 0xa44   : > { %v2962_v9 = vld [vmem:[%s3512_s19 + $0x10] sm:$0xff]   ;;  %v3034_v32 = vld [vmem:[#allocation8 + $0x14] ss:$8 sps:$4 sm:$0xff] (!%p2579_p10)  }
 0xa45   : > { %2798 = vmatmul.mubr.msk.bf16.vlgmr.msra.gmra.mrb[32].mxu0 %vm1617_vm7, %v1584_v10  ;;  %v2963_v10 = vld [vmem:[%s3512_s19 + $0x58] sm:$0xff]  }
 0xa46   : > { %1924 = vmatpush1.bf16.msra.mxu0 %v2912_v13  ;;  %1955 = vmatprep.mubr.bf16.mxu0 %v3240_v44  ;;  %v2966_v13 = vld [vmem:[%s3512_s19 + $0x20] sm:$0xff]  }
 0xa47   : > { %1925 = vmatprep.subr.bf16.mxu0 %v2920_v15  ;;  %v2969_v15 = vld [vmem:[%s3512_s19 + $0x70] sm:$0xff]  }
 0xa4a   : > { %1926 = vmatpush1.bf16.msra.mxu0 %v2918_v17  ;;  %v2971_v17 = vld [vmem:[%s3512_s19 + $0x78] sm:$0xff]   ;;  %s3884_s19 = sld [smem:[#allocation18_spill]] (!%p2579_p10) }
 0xa4b   : > { %1927 = vmatprep.subr.bf16.mxu0 %v2926_v20 }
 0xa4e   : > { %1928 = vmatpush1.bf16.msra.mxu0 %v2924_v22 }
 0xa4f   : > { %1929 = vmatprep.subr.bf16.mxu0 %v2932_v1 }
 0xa52   : > { %1930 = vmatpush1.bf16.msra.mxu0 %v2930_v48 }
 0xa53   : > { %1931 = vmatprep.subr.bf16.mxu0 %v2938_v37 }
 0xa56   : > { %1932 = vmatpush1.bf16.msra.mxu0 %v2936_v35 }
 0xa57   : > { %1933 = vmatprep.subr.bf16.mxu0 %v2944_v39 }
 0xa5a   : > { %1934 = vmatpush1.bf16.msra.mxu0 %v2942_v41 }
 0xa5b   : > { %1935 = vmatprep.subr.bf16.mxu0 %v2950_v43 }
 0xa5e   : > { %1936 = vmatpush1.bf16.msra.mxu0 %v2948_v46 }
 0xa5f   : > { %1937 = vmatprep.subr.bf16.mxu0 %v2956_v49 }
 0xa62   : > { %1938 = vmatpush1.bf16.msra.mxu0 %v2954_v5 }
 0xb18   : > { %v1655_v24 = vpop.f32.mrb[32].mxu0 }
 0xb19   : > { %v3751_v26 = vadd.f32 %v3029_v25, %v1655_v24  ;;  %v2799_v27 = vpop.f32.mrb[33].mxu0 }
 0xb1a   : > { %v1658_v28 = vpop.f32.mrb[34].mxu0 }
 0xb1b   : > { %v3753_v30 = vadd.f32 %v3030_v29, %v1658_v28  ;;  %v2800_v31 = vpop.f32.mrb[35].mxu0  ;;  %v1665_v19 = vmul.f32 %v3751_v26, %v3751_v26 }
 0xb1d   : > { %1667 = vadd.xlane.f32.xlu0 %v1665_v19  ;;  %v1666_v33 = vmul.f32 %v3753_v30, %v3753_v30 }
 0xb1f   : > { %1669 = vadd.xlane.f32.xlu1 %v1666_v33 }
 0xbaa   : > { %v1668_v53 = vpop.xlane.xlu0 %1667 }
 0xbab   : > { %v1671_v54 = vmul.f32 0.015625, %v1668_v53 }
 0xbac   : > { %v1670_v55 = vpop.xlane.xlu1 %1669 }
 0xbad   : > { %v1673_v56 = vadd.f32 1e-05, %v1671_v54  ;;  %v1672_v57 = vmul.f32 0.015625, %v1670_v55 }
 0xbaf   : > { %3009 = vrsqrt.f32 %v1673_v56  ;;  %v1674_v58 = vadd.f32 1e-05, %v1672_v57 }
 0xbb1   : > { %3011 = vrsqrt.f32 %v1674_v58 }
 0xbb9   : > { %v3010_v59 = vpop.eup %3009 }
 0xbba   : > { %v1677_v62 = vmul.f32 %v3010_v59, %v3751_v26 }
 0xbbb   : > { %v3012_v63 = vpop.eup %3011 }
 0xbbc   : > { %v1678_v2 = vmul.f32 %v3012_v63, %v3753_v30  ;;  %v1685_v3 = vmul.f32 %v2526_v0, %v1677_v62 }
 0xbbe   : > { %v1686_v4 = vmul.f32 %v2526_v0, %v1678_v2 }
 0xbc0   : > { %v1687_v6 = vpack.c.bf16 %v1686_v4, %v1685_v3  ;;  %v3031_v3 = vld [vmem:[#allocation8 + $0x4] ss:$8 sps:$4 sm:$0xff] (!%p2579_p10)   ;;  %v3033_v4 = vld [vmem:[#allocation8] ss:$8 sps:$4 sm:$0xff] (!%p2579_p10)  }
 0xbc1   : > { %2297 = vmatprep.subr.bf16.mxu0 (!%p2579_p10), %v3031_v3 }
 0xbc2   : > { %1913 = vmatmul.mubr.bf16.vlgmr.msra.gmra.mrb[36].mxu1 %v1687_v6  ;;  %1956 = vmatmul.mubr.bf16.vlgmr.msra.gmra.mrb[36].mxu0 %v1687_v6 }
 0xbc3   : > { %2652 = vmatpush3.bf16.msra.mxu1 %v2958_v36  ;;  %v3036_v36 = vld [vmem:[#allocation8 + $0x10] ss:$8 sps:$4 sm:$0xff] (!%p2579_p10)   ;;  %2298 = vmatpush1.bf16.msra.mxu0 (!%p2579_p10), %v3033_v4 }
 0xbc4   : > { %2653 = vmatprep.subr.bf16.mxu1 %v2959_v60  ;;  %2299 = vmatprep.subr.bf16.mxu0 (!%p2579_p10), %v3034_v32  ;;  %v3039_v60 = vld [vmem:[#allocation8 + $0x20] ss:$8 sps:$4 sm:$0xff] (!%p2579_p10)  }
 0xbc7   : > { %2654 = vmatpush3.bf16.msra.mxu1 %v2960_v7  ;;  %2300 = vmatpush1.bf16.msra.mxu0 (!%p2579_p10), %v3036_v36  ;;  %v3042_v7 = vld [vmem:[#allocation8 + $0x30] ss:$8 sps:$4 sm:$0xff] (!%p2579_p10)  }
 0xbc8   : > { %2655 = vmatprep.subr.bf16.mxu1 %v2961_v8  ;;  %v3043_v8 = vld [vmem:[#allocation8 + $0x44] ss:$8 sps:$4 sm:$0xff] (!%p2579_p10)  }
 0xbcb   : > { %2656 = vmatpush3.bf16.msra.mxu1 %v2962_v9  ;;  %v3045_v9 = vld [vmem:[#allocation8 + $0x40] ss:$8 sps:$4 sm:$0xff] (!%p2579_p10)  }
 0xbcc   : > { %2657 = vmatprep.subr.bf16.mxu1 %v2963_v10  ;;  %v3046_v10 = vld [vmem:[#allocation8 + $0x54] ss:$8 sps:$4 sm:$0xff] (!%p2579_p10)  }
 0xbcf   : > { %2658 = vmatpush3.bf16.msra.mxu1 %v2964_v11  ;;  %v3048_v11 = vld [vmem:[#allocation8 + $0x50] ss:$8 sps:$4 sm:$0xff] (!%p2579_p10)  }
 0xbd0   : > { %2659 = vmatprep.subr.bf16.mxu1 %v2965_v61  ;;  %v3049_v61 = vld [vmem:[#allocation8 + $0x64] ss:$8 sps:$4 sm:$0xff] (!%p2579_p10)  }
 0xbd3   : > { %2660 = vmatpush3.bf16.msra.mxu1 %v2966_v13  ;;  %v3051_v13 = vld [vmem:[#allocation8 + $0x60] ss:$8 sps:$4 sm:$0xff] (!%p2579_p10)  }
 0xbd4   : > { %2661 = vmatprep.subr.bf16.mxu1 %v2967_v14  ;;  %v3052_v14 = vld [vmem:[#allocation8 + $0x74] ss:$8 sps:$4 sm:$0xff] (!%p2579_p10)  }
 0xbd7   : > { %2662 = vmatpush3.bf16.msra.mxu1 %v2968_v50  ;;  %v3054_v50 = vld [vmem:[#allocation8 + $0x70] ss:$8 sps:$4 sm:$0xff] (!%p2579_p10)  }
 0xbd8   : > { %2663 = vmatprep.subr.bf16.mxu1 %v2969_v15  ;;  %v3241_v15 = vmov (!%p2579_p10), 0  }
 0xbd9   : > { %2329 = vmatprep.mubr.bf16.mxu0 (!%p2579_p10), %v3241_v15 }
 0xbdb   : > { %2664 = vmatpush3.bf16.msra.mxu1 %v2970_v16 }
 0xbdc   : > { %2665 = vmatprep.subr.bf16.mxu1 %v2971_v17 }
 0xbdf   : > { %2666 = vmatpush3.bf16.msra.mxu1 %v2972_v18 }
 0xc95   : > { %v1914_v20 = vpop.f32.mrb[36].mxu1  ;;  %v1957_v21 = vpop.f32.mrb[36].mxu0 }
 0xc96   : > { %v2559_v22 = vmul.f32 -1.442695, %v1914_v20  ;;  %v1916_v24 = vpop.f32.mrb[37].mxu1  ;;  %v1959_v25 = vpop.f32.mrb[37].mxu0 }
 0xc97   : > { %v2560_v27 = vmul.f32 -1.442695, %v1916_v24  ;;  %v1918_v28 = vpop.f32.mrb[38].mxu1  ;;  %v1961_v29 = vpop.f32.mrb[38].mxu0 }
 0xc98   : > { %3013 = vpow2.f32 %v2559_v22  ;;  %v2561_v31 = vmul.f32 -1.442695, %v1918_v28  ;;  %v1920_v19 = vpop.f32.mrb[39].mxu1  ;;  %v1963_v33 = vpop.f32.mrb[39].mxu0 }
 0xc99   : > { %3015 = vpow2.f32 %v2560_v27  ;;  %v2562_v34 = vmul.f32 -1.442695, %v1920_v19 }
 0xc9a   : > { %3017 = vpow2.f32 %v2561_v31 }
 0xc9b   : > { %3019 = vpow2.f32 %v2562_v34 }
 0xca2   : > { %v3014_v1 = vpop.eup %3013 }
 0xca3   : > { %v3016_v12 = vpop.eup %3015  ;;  %v1978_v48 = vadd.f32 1.0, %v3014_v1 }
 0xca4   : > { %v3018_v23 = vpop.eup %3017  ;;  %v1979_v51 = vadd.f32 1.0, %v3016_v12 }
 0xca5   : > { %v3020_v35 = vpop.eup %3019  ;;  %3021 = vrcp.f32 %v1978_v48  ;;  %v1980_v37 = vadd.f32 1.0, %v3018_v23 }
 0xca6   : > { %3023 = vrcp.f32 %v1979_v51  ;;  %v1981_v38 = vadd.f32 1.0, %v3020_v35 }
 0xca7   : > { %3025 = vrcp.f32 %v1980_v37 }
 0xca8   : > { %3027 = vrcp.f32 %v1981_v38 }
 0xcaf   : > { %v3022_v39 = vpop.eup %3021 }
 0xcb0   : > { %v3024_v40 = vpop.eup %3023  ;;  %v1990_v41 = vmul.f32 %v3022_v39, %v1914_v20 }
 0xcb1   : > { %v3026_v42 = vpop.eup %3025  ;;  %v1991_v43 = vmul.f32 %v3024_v40, %v1916_v24 }
 0xcb2   : > { %v3028_v44 = vpop.eup %3027  ;;  %v1994_v45 = vmul.f32 %v1990_v41, %v1957_v21  ;;  %v1992_v46 = vmul.f32 %v3026_v42, %v1918_v28  ;;  %v2580_v28 = vld [vmem:[%s3884_s19] ss:$0 sm:$0xff] (!%p2579_p10) }
 0xcb3   : > { %v1995_v47 = vmul.f32 %v1991_v43, %v1959_v25  ;;  %v1993_v49 = vmul.f32 %v3028_v44, %v1920_v19 }
 0xcb4   : > { %v1996_v52 = vmul.f32 %v1992_v46, %v1961_v29 }
 0xcb5   : > { %v1997_v5 = vmul.f32 %v1993_v49, %v1963_v33 }
 0xcb6   : > { %v1998_v53 = vpack.c.bf16 %v1996_v52, %v1994_v45 }
 0xcb7   : > { %v1999_v54 = vpack.c.bf16 %v1997_v5, %v1995_v47 }
 0xcb9   : > { %2160 = vmatprep.mubr.bf16.mxu1 %v1999_v54 }
 0xcba   : > { %2161 = vmatmul.mubr.bf16.vlgmr.msra.gmra.mrb[40].mxu1 %v1998_v53 }
 0xd8d   : > { %v2667_v55 = vpop.f32.mrb[40].mxu1 }
 0xd8e   : > { %v2668_v56 = vpop.f32.mrb[41].mxu1 }
 0xd8f   : > { %v2669_v57 = vadd.f32 %v2668_v56, %v2667_v55  ;;  %v2670_v58 = vpop.f32.mrb[42].mxu1  ;;  %2176 = sbr.rel (%p2579_p10) target bundleno = 3860 (0xf14), region = 88 }
 0xd90   : > { %v2671_v59 = vpop.f32.mrb[43].mxu1 }
 0xd91   : > { %v2169_v62 = vadd.f32 %v2669_v57, %v3751_v26  ;;  %v2672_v63 = vadd.f32 %v2671_v59, %v2670_v58  ;;  %v3037_v26 = vld [vmem:[#allocation8 + $0x24] ss:$8 sps:$4 sm:$0xff] (!%p2579_p10)  }
 0xd92   : > { %2301 = vmatprep.subr.bf16.mxu0 (!%p2579_p10), %v3037_v26 }
 0xd93   : > { %2171 = vst [vmem:[#allocation2] sm:$0xff] %v2169_v62  ;;  %v2170_v0 = vadd.f32 %v2672_v63, %v3753_v30  ;;  %v2178_v2 = vmul.f32 (!%p2579_p10), %v2169_v62, %v2169_v62  ;;  %2302 = vmatpush1.bf16.msra.mxu0 (!%p2579_p10), %v3039_v60  ;;  %v3040_v30 = vld [vmem:[#allocation8 + $0x34] ss:$8 sps:$4 sm:$0xff] (!%p2579_p10)  }
 0xd94   : > { %2303 = vmatprep.subr.bf16.mxu0 (!%p2579_p10), %v3040_v30 }
 0xd95   : > { %2172 = vst [vmem:[#allocation2 + $0x8] sm:$0xff] %v2170_v0  ;;  %2180 = vadd.xlane.f32.xlu0 (!%p2579_p10), %v2178_v2  ;;  %v2179_v6 = vmul.f32 (!%p2579_p10), %v2170_v0, %v2170_v0 }
 0xd97   : > { %2304 = vmatpush1.bf16.msra.mxu0 %v3042_v7 }
 0xd98   : > { %2305 = vmatprep.subr.bf16.mxu0 %v3043_v8 }
 0xd99   : > { %2182 = vadd.xlane.f32.xlu0 %v2179_v6 }
 0xd9b   : > { %2306 = vmatpush1.bf16.msra.mxu0 %v3045_v9 }
 0xd9c   : > { %2307 = vmatprep.subr.bf16.mxu0 %v3046_v10 }
 0xd9f   : > { %2308 = vmatpush1.bf16.msra.mxu0 %v3048_v11 }
 0xda0   : > { %2309 = vmatprep.subr.bf16.mxu0 %v3049_v61 }
 0xda3   : > { %2310 = vmatpush1.bf16.msra.mxu0 %v3051_v13 }
 0xda4   : > { %2311 = vmatprep.subr.bf16.mxu0 %v3052_v14 }
 0xda7   : > { %2312 = vmatpush1.bf16.msra.mxu0 %v3054_v50 }
 0xe22   : > { %v2181_v16 = vpop.xlane.xlu0 %2180 }
 0xe23   : > { %v2184_v17 = vmul.f32 0.015625, %v2181_v16 }
 0xe25   : > { %v2186_v18 = vadd.f32 1e-05, %v2184_v17 }
 0xe26   : > { %v2183_v20 = vpop.xlane.xlu0 %2182 }
 0xe27   : > { %3055 = vrsqrt.f32 %v2186_v18  ;;  %v2185_v21 = vmul.f32 0.015625, %v2183_v20 }
 0xe29   : > { %v2187_v22 = vadd.f32 1e-05, %v2185_v21 }
 0xe2b   : > { %3057 = vrsqrt.f32 %v2187_v22 }
 0xe31   : > { %v3056_v24 = vpop.eup %3055 }
 0xe32   : > { %v2190_v25 = vmul.f32 %v3056_v24, %v2169_v62 }
 0xe34   : > { %v2198_v19 = vmul.f32 %v2580_v28, %v2190_v25 }
 0xe35   : > { %v3058_v27 = vpop.eup %3057 }
 0xe36   : > { %v2191_v29 = vmul.f32 %v3058_v27, %v2170_v0 }
 0xe38   : > { %v2199_v31 = vmul.f32 %v2580_v28, %v2191_v29 }
 0xe3a   : > { %v2200_v33 = vpack.c.bf16 %v2199_v31, %v2198_v19 }
 0xe3c   : > { %2330 = vmatmul.mubr.bf16.vlgmr.msra.gmra.mrb[0].mxu0 %v2200_v33 }
 0xf0f   : > { %v2331_v34 = vpop.f32.mrb[0].mxu0 }
 0xf10   : > { %2340 = vst [vmem:[#allocation9] sm:$0xff] %v2331_v34  ;;  %v2333_v1 = vpop.f32.mrb[1].mxu0 }
 0xf11   : > { %2341 = vst [vmem:[#allocation9 + $0x8] sm:$0xff] %v2333_v1  ;;  %v2335_v12 = vpop.f32.mrb[2].mxu0 }
 0xf12   : > { %2342 = vst [vmem:[#allocation9 + $0x10] sm:$0xff] %v2335_v12  ;;  %v2337_v48 = vpop.f32.mrb[3].mxu0 }
 0xf13   : > { %2343 = vst [vmem:[#allocation9 + $0x18] sm:$0xff] %v2337_v48 }
 0xf14 PF: > { %p2827_p12 = scmp.eq.s32.totalorder %s3328_s25, 1  ;;  %s3242_s10 = smov [#allocation9]  }
 0xf15   : > { %s2350_s15 = sshll.u32 %s3242_s10, 4  ;;  %s2351_s15 = int_to_ptr.vmem [resolvable:$true] %s2350_s15 }
 0xf16   : > { %s3147_s29 = scalar_lea.vmem %s2351_s15, 512  ;;  %p3154_p3 = scmp.lt.s32.totalorder %s2351_s15, %s2351_s15 }
 0xf17   : > { %p3148_p0 = scmp.ne.s32.totalorder %s2351_s15, %s3147_s29  ;;  %p3155_p9 = scmp.lt.s32.totalorder %s3147_s29, %s3147_s29 }
 0xf19   : > { %p3149_p2 = pnand %p3148_p0, %p2827_p12  ;;  %p3156_p1 = por %p3155_p9, %p3154_p3 }
 0xf1b   : > { %p3150_p13 = pneg %p3149_p2 }
 0xf1d   : > { %p3157_p11 = pnand %p3156_p1, %p3150_p13 }
 0xf1f   : > { %3160 = shalt.err (!%p3157_p11)
}
 0xf20   : > { %s3885_s24 = sld [smem:[#allocation20_spill]] }
 0xf26   : > { %s3886_s16 = smov %s3885_s24  ;;  %s3161_s23 = scalar_lea.hbm %s3885_s24, 512 }
 0xf27   : > { %p3162_p7 = scmp.ne.s32.totalorder %s3886_s16, %s3161_s23  ;;  %p3167_p5 = scmp.lt.u32.totalorder %s3161_s23, %s3886_s16 }
 0xf29   : > { %p3163_p8 = pnand %p3162_p7, %p2827_p12 }
 0xf2b   : > { %p3164_p4 = pneg %p3163_p8 }
 0xf2d   : > { %p3169_p6 = pnand %p3167_p5, %p3164_p4 }
 0xf2f   : > { %3172 = shalt.err (!%p3169_p6)
}
 0xf30   : > { %s3243_s18 = smov 256  }
 0xf31   : > { %2810 = dma.vmem_to_hbm [thread:$0]  (%p2827_p12), %s2351_s15, 512, %s3886_s16, [#allocation5], %s3243_s18, %s3243_s18, %s3238_s21  }
 0xf32   : > { %3202 = dma.done.wait (%p2827_p12), [#allocation5], 512  }
 0xf33   : > { %3204 = vsyncadd (%p2827_p12), [#allocation5], 4294966784 }
 0xf34 PF: > { %s3887_s24 = sld [smem:[#allocation15_spill]]  ;;  %s3888_s30 = sld [smem:[#allocation14_spill]] }
 0xf35   : > { %s3889_s23 = sld [smem:[#allocation16_spill]]  ;;  %s3890_s21 = smov %s3211_s22 }
 0xf3a   : > { %p26_p10 = scmp.ge.s32.totalorder %s3887_s24, 4   ;;  %s3891_s22 = smov %s3888_s30 }
 0xf3c   :  { %28 = sbr.rel (!%p26_p10) target bundleno = 11 (0xb), region = 142 }
 0xf43   :  { %2366 = vsyncpa [#allocation4], 1 }
 0xf44   :  { %2368 = vsyncpa [#allocation4 + $0x1], 1 }
 0xf45   :  { %2369 = vsyncpa [#allocation7], 1 }
 0xf46   :  { %2371 = vsyncpa [#allocation7 + $0x1], 1 }
 0xf47   :  { %2372 = vsyncpa [#allocation5], 1 }
 0xf48   :  { %2374 = vsyncpa [#allocation5 + $0x1], 1 }

</bundles_post_ra>
